<compile_context>
chip_gen: v5e
topology: v5e:2x2
jax: 0.10.0
libtpu: 0.0.40
codegen_flags: <defaults>
</compile_context>

<pallas_src>
import functools
import math

import jax
import jax.numpy as jnp
from jax.experimental import pallas as pl
from jax.experimental.pallas import tpu as pltpu

_NEG = -1e30  # large finite mask bias (avoids 0/0 NaN if a row were fully masked)


def _mask_bias(K, attention_size, subsequent):
    """Additive attention-bias matrix, built once in the wrapper (hoisted)."""
    ii, jj = jnp.indices((K, K))
    bias = jnp.zeros((K, K), jnp.float32)
    if attention_size is not None:
        bias = jnp.where(jnp.abs(ii - jj) > attention_size, _NEG, bias)
    if subsequent:
        bias = jnp.where(jj > ii, _NEG, bias)
    return bias


def _decoder_kernel(x_ref, mem_ref, mbs_ref, *rest,
                    h, dq, dv, K, d_model, TB, cross_has_mask):
    f32 = jnp.float32
    bf16 = jnp.bfloat16
    hq = h * dq
    hv = h * dv

    o_ref = rest[-1]
    wrefs = rest[:-1]
    if cross_has_mask:
        mbc_ref, wrefs = wrefs[0], wrefs[1:]
    else:
        mbc_ref = None
    (wqkv_s_ref, bqkv_s_ref, wo_s_ref, bo_s_ref, g1_ref, be1_ref,
     wq_c_ref, bq_c_ref, wkv_c_ref, bkv_c_ref, wo_c_ref, bo_c_ref,
     g2_ref, be2_ref,
     w1_ref, b1_ref, w2_ref, b2_ref, g3_ref, be3_ref) = wrefs

    # Flat 2D activations (TB*K, d_model) — no in-kernel reshapes needed.
    x = x_ref[...]
    mem = mem_ref[...]

    mask_self = mbs_ref[...]
    mask_cross = mbc_ref[...] if cross_has_mask else None

    def proj(act_f32, w_ref, b_ref):
        # bf16 matmul operands (weights pre-cast in wrapper), f32 accumulation.
        return (jnp.dot(act_f32.astype(bf16), w_ref[...],
                        preferred_element_type=f32) + b_ref[...])

    def split_heads(Z, d):
        """(TB*K, h*d) -> (h*TB, K, d); head-major batch, matching torch cat(chunk(h,-1),0)."""
        Z3 = Z.reshape(TB, K, h * d)                      # leading-dim split only
        return jnp.concatenate([Z3[:, :, i * d:(i + 1) * d] for i in range(h)], axis=0)

    def attention(Q, Kp, Vp, bias):
        """All heads & batch elements in one batched contraction (no explicit K^T)."""
        Qb = split_heads(Q, dq)                           # (h*TB, K, dq)
        Kb = split_heads(Kp, dq)
        Vb = split_heads(Vp, dv)
        # 1/sqrt(K) already folded into Wq/bq in the wrapper.
        s = jnp.einsum('bqd,bkd->bqk', Qb, Kb, preferred_element_type=f32)
        if bias is not None:
            s = s + bias                                  # (K,K) additive mask, bcast over batch
        m = jnp.max(s, axis=-1, keepdims=True)
        p = jnp.exp(s - m)
        inv = pl.reciprocal(jnp.sum(p, axis=-1, keepdims=True), approx=True)  # EUP slot
        probs = p * inv
        attn = jnp.einsum('bqk,bkd->bqd', probs, Vb, preferred_element_type=f32)  # (h*TB,K,dv)
        # Repack heads: per-head (TB,K,dv) chunks concatenated along the feature dim.
        heads = jnp.concatenate([attn[i * TB:(i + 1) * TB] for i in range(h)], axis=-1)
        return heads.reshape(TB * K, hv)

    def layer_norm(z, g, b, eps=1e-5):
        mu = jnp.mean(z, axis=-1, keepdims=True)
        zc = z - mu
        var = jnp.mean(zc * zc, axis=-1, keepdims=True)
        return zc * jax.lax.rsqrt(var + eps) * g + b

    # ---- self-attention (mask='subsequent'): fused QKV projection ---------------
    qkv = proj(x, wqkv_s_ref, bqkv_s_ref)
    sa = attention(qkv[:, :hq], qkv[:, hq:2 * hq], qkv[:, 2 * hq:2 * hq + hv], mask_self)
    sa = proj(sa, wo_s_ref, bo_s_ref)
    y = layer_norm(x + sa, g1_ref[...], be1_ref[...])

    # ---- encoder-decoder attention: fused KV projection of memory --------------
    qc = proj(y, wq_c_ref, bq_c_ref)
    kvc = proj(mem, wkv_c_ref, bkv_c_ref)
    ca = attention(qc, kvc[:, :hq], kvc[:, hq:hq + hv], mask_cross)
    ca = proj(ca, wo_c_ref, bo_c_ref)
    y = layer_norm(y + ca, g2_ref[...], be2_ref[...])

    # ---- position-wise feed forward (two Linears, NO ReLU — matches PyTorch) ---
    ff = proj(proj(y, w1_ref, b1_ref), w2_ref, b2_ref)
    y = layer_norm(y + ff, g3_ref[...], be3_ref[...])

    o_ref[...] = y.astype(o_ref.dtype)


def _pick_batch_tile(B, K, target_rows=256):
    """Pick a batch tile: divides B, satisfies the (8,128) block rule, targets
    TB*K ~ 256 rows (MXU fill) and prefers >=2 grid steps (v7x has 2 TensorCores)."""
    cands = [d for d in range(1, B + 1) if B % d == 0 and (d == B or d % 8 == 0)]
    fitting = [d for d in cands if d * K <= target_rows]
    tb = max(fitting) if fitting else min(cands)
    two_step = [d for d in cands if B // d >= 2 and d * K >= 64]
    if B // tb < 2 and two_step:
        tb = max(two_step)
    return tb


def decoder_forward(x, memory, params, *, h, q_dim, v_dim,
                    attention_size=None, batch_tile=None):
    """Pallas Decoder forward. x/memory: (B, K, d_model) f32. Weights stored
    pre-transposed (in_features, out_features); biases as (1, out)."""
    B, K, d_model = x.shape
    p = params
    bf16 = jnp.bfloat16

    TB = _pick_batch_tile(B, K) if batch_tile is None else batch_tile
    assert B % TB == 0, "batch must be divisible by the batch tile"
    rows = TB * K
    assert rows == B * K or rows % 8 == 0, "block rows must be a multiple of 8"

    # Fold 1/sqrt(K) score scale into Wq/bq; fuse QKV (self) and KV (cross); cast
    # matmul weights to bf16 (biases / LN params stay f32).
    scale = 1.0 / math.sqrt(K)            # module scales by 1/sqrt(K) (seq len) — parity
    w_qkv_s = jnp.concatenate([p["wq_s"] * scale, p["wk_s"], p["wv_s"]], axis=1).astype(bf16)
    b_qkv_s = jnp.concatenate([p["bq_s"] * scale, p["bk_s"], p["bv_s"]], axis=1)
    wq_c = (p["wq_c"] * scale).astype(bf16)
    bq_c = p["bq_c"] * scale
    w_kv_c = jnp.concatenate([p["wk_c"], p["wv_c"]], axis=1).astype(bf16)
    b_kv_c = jnp.concatenate([p["bk_c"], p["bv_c"]], axis=1)

    weights = [
        w_qkv_s, b_qkv_s, p["wo_s"].astype(bf16), p["bo_s"], p["g1"], p["be1"],
        wq_c, bq_c, w_kv_c, b_kv_c, p["wo_c"].astype(bf16), p["bo_c"], p["g2"], p["be2"],
        p["w1"].astype(bf16), p["b1"], p["w2"].astype(bf16), p["b2"], p["g3"], p["be3"],
    ]

    cross_has_mask = attention_size is not None
    masks = [_mask_bias(K, attention_size, subsequent=True)]
    if cross_has_mask:
        masks.append(_mask_bias(K, attention_size, subsequent=False))

    # Flat 2D activation layout (free reshape in XLA, zero reshapes inside the kernel).
    x2 = x.reshape(B * K, d_model)
    mem2 = memory.reshape(B * K, d_model)

    kernel = functools.partial(
        _decoder_kernel, h=h, dq=q_dim, dv=v_dim, K=K, d_model=d_model, TB=TB,
        cross_has_mask=cross_has_mask)

    tile_spec = pl.BlockSpec((rows, d_model), lambda i: (i, 0))

    def full_spec(a):
        return pl.BlockSpec(a.shape, lambda i, _nd=a.ndim: (0,) * _nd)

    in_specs = ([tile_spec, tile_spec]
                + [full_spec(m) for m in masks]
                + [full_spec(w) for w in weights])

    out2 = pl.pallas_call(
        kernel,
        out_shape=jax.ShapeDtypeStruct((B * K, d_model), jnp.float32),
        grid_spec=pltpu.PrefetchScalarGridSpec(
            num_scalar_prefetch=0,
            grid=(B // TB,),
            in_specs=in_specs,
            out_specs=tile_spec,
        ),
        compiler_params=pltpu.CompilerParams(
            dimension_semantics=("parallel",)),
    )(x2, mem2, *masks, *weights)
    return out2.reshape(B, K, d_model)


# ----------------------------------------------------------------------------
# Pure-JAX f32 reference mirroring the PyTorch Decoder forward exactly (eval mode).
# ----------------------------------------------------------------------------
def _decoder_ref(x, memory, p, *, h, q_dim, v_dim, attention_size=None):
    def mha(q, k, v, wq, bq, wk, bk, wv, bv, wo, bo, mask):
        B, K, _ = q.shape
        Q = q @ wq + bq
        Kp = k @ wk + bk
        Vp = v @ wv + bv

        def split(z, d):  # torch.cat(chunk(h, dim=-1), dim=0)
            return jnp.concatenate([z[..., i * d:(i + 1) * d] for i in range(h)], axis=0)

        Qh, Kh, Vh = split(Q, q_dim), split(Kp, q_dim), split(Vp, v_dim)
        scores = jnp.einsum("bik,bjk->bij", Qh, Kh) / jnp.sqrt(jnp.float32(K))
        ii, jj = jnp.indices((K, K))
        if attention_size is not None:
            scores = jnp.where(jnp.abs(ii - jj) > attention_size, -jnp.inf, scores)
        if mask == "subsequent":
            scores = jnp.where(jj > ii, -jnp.inf, scores)
        probs = jax.nn.softmax(scores, axis=-1)
        attn = jnp.einsum("bij,bjd->bid", probs, Vh)
        heads = jnp.concatenate([attn[i * B:(i + 1) * B] for i in range(h)], axis=-1)
        return heads @ wo + bo

    def ln(z, g, b, eps=1e-5):
        mu = z.mean(-1, keepdims=True)
        var = ((z - mu) ** 2).mean(-1, keepdims=True)
        return (z - mu) / jnp.sqrt(var + eps) * g + b

    sa = mha(x, x, x, p["wq_s"], p["bq_s"], p["wk_s"], p["bk_s"], p["wv_s"], p["bv_s"],
             p["wo_s"], p["bo_s"], mask="subsequent")
    y = ln(x + sa, p["g1"], p["be1"])
    ca = mha(y, memory, memory, p["wq_c"], p["bq_c"], p["wk_c"], p["bk_c"],
             p["wv_c"], p["bv_c"], p["wo_c"], p["bo_c"], mask=None)
    y = ln(y + ca, p["g2"], p["be2"])
    ff = (y @ p["w1"] + p["b1"]) @ p["w2"] + p["b2"]   # no ReLU (matches module code)
    return ln(y + ff, p["g3"], p["be3"])


def _check(out, ref, tag):
    max_abs = float(jnp.max(jnp.abs(out - ref)))
    rel_fro = float(jnp.linalg.norm(out - ref) / jnp.linalg.norm(ref))
    # bf16 projection/FF matmuls + approx reciprocal introduce ~1e-2-level max error
    # vs the f32 reference; tolerances below leave margin while staying meaningful.
    assert max_abs < 5e-2, f"{tag}: max abs err {max_abs}"
    assert rel_fro < 2.5e-2, f"{tag}: rel Frobenius err {rel_fro}"


if __name__ == "__main__":
    # Small shapes consistent with the module: d_model=32, q=v=8, h=4, B=2, K=8.
    # FF hidden uses the module's default d_ff=2048.
    B, K, d_model = 2, 8, 32
    q_dim = v_dim = 8
    h = 4
    d_ff = 2048

    keys = iter(jax.random.split(jax.random.PRNGKey(0), 32))

    def init(shape, scale=0.1):
        return jax.random.normal(next(keys), shape, dtype=jnp.float32) * scale

    params = dict(
        # self-attention
        wq_s=init((d_model, q_dim * h)), bq_s=init((1, q_dim * h)),
        wk_s=init((d_model, q_dim * h)), bk_s=init((1, q_dim * h)),
        wv_s=init((d_model, v_dim * h)), bv_s=init((1, v_dim * h)),
        wo_s=init((h * v_dim, d_model)), bo_s=init((1, d_model)),
        # encoder-decoder attention
        wq_c=init((d_model, q_dim * h)), bq_c=init((1, q_dim * h)),
        wk_c=init((d_model, q_dim * h)), bk_c=init((1, q_dim * h)),
        wv_c=init((d_model, v_dim * h)), bv_c=init((1, v_dim * h)),
        wo_c=init((h * v_dim, d_model)), bo_c=init((1, d_model)),
        # feed forward
        w1=init((d_model, d_ff), 0.05), b1=init((1, d_ff), 0.05),
        w2=init((d_ff, d_model), 0.05), b2=init((1, d_model), 0.05),
        # layer norms
        g1=1.0 + init((1, d_model), 0.05), be1=init((1, d_model), 0.05),
        g2=1.0 + init((1, d_model), 0.05), be2=init((1, d_model), 0.05),
        g3=1.0 + init((1, d_model), 0.05), be3=init((1, d_model), 0.05),
    )

    x = jax.random.normal(next(keys), (B, K, d_model), dtype=jnp.float32)
    memory = jax.random.normal(next(keys), (B, K, d_model), dtype=jnp.float32)

    # Default path: attention_size=None (self-attn still uses the 'subsequent' mask).
    out = decoder_forward(x, memory, params, h=h, q_dim=q_dim, v_dim=v_dim,
                          attention_size=None)
    out = jax.block_until_ready(out)
    assert out.shape == (B, K, d_model)
    ref = _decoder_ref(x, memory, params, h=h, q_dim=q_dim, v_dim=v_dim,
                       attention_size=None)
    _check(out, ref, "default")

    # Also exercise the local-attention (attention_size) path.
    out2 = jax.block_until_ready(
        decoder_forward(x, memory, params, h=h, q_dim=q_dim, v_dim=v_dim,
                        attention_size=2))
    ref2 = _decoder_ref(x, memory, params, h=h, q_dim=q_dim, v_dim=v_dim,
                        attention_size=2)
    _check(out2, ref2, "local-mask")

    print("KERNEL_OK")
</pallas_src>

<mosaic_0001>
module attributes {stable_mosaic.version = 11 : i64} {
  func.func @_decoder_kernel(%arg0: i32, %arg1: memref<16x32xf32, #tpu.memory_space<vmem>>, %arg2: memref<16x32xf32, #tpu.memory_space<vmem>>, %arg3: memref<8x8xf32, #tpu.memory_space<vmem>>, %arg4: memref<32x96xbf16, #tpu.memory_space<vmem>>, %arg5: memref<1x96xf32, #tpu.memory_space<vmem>>, %arg6: memref<32x32xbf16, #tpu.memory_space<vmem>>, %arg7: memref<1x32xf32, #tpu.memory_space<vmem>>, %arg8: memref<1x32xf32, #tpu.memory_space<vmem>>, %arg9: memref<1x32xf32, #tpu.memory_space<vmem>>, %arg10: memref<32x32xbf16, #tpu.memory_space<vmem>>, %arg11: memref<1x32xf32, #tpu.memory_space<vmem>>, %arg12: memref<32x64xbf16, #tpu.memory_space<vmem>>, %arg13: memref<1x64xf32, #tpu.memory_space<vmem>>, %arg14: memref<32x32xbf16, #tpu.memory_space<vmem>>, %arg15: memref<1x32xf32, #tpu.memory_space<vmem>>, %arg16: memref<1x32xf32, #tpu.memory_space<vmem>>, %arg17: memref<1x32xf32, #tpu.memory_space<vmem>>, %arg18: memref<32x2048xbf16, #tpu.memory_space<vmem>>, %arg19: memref<1x2048xf32, #tpu.memory_space<vmem>>, %arg20: memref<2048x32xbf16, #tpu.memory_space<vmem>>, %arg21: memref<1x32xf32, #tpu.memory_space<vmem>>, %arg22: memref<1x32xf32, #tpu.memory_space<vmem>>, %arg23: memref<1x32xf32, #tpu.memory_space<vmem>>, %arg24: memref<16x32xf32, #tpu.memory_space<vmem>>) attributes {dimension_semantics = [#tpu.dimension_semantics<parallel>], iteration_bounds = array<i64: 1>, scalar_prefetch = 0 : i64, scratch_operands = 0 : i64, tpu.core_type = #tpu.core_type<tc>, window_params = [{transform_indices = @transform_0, window_bounds = array<i64: 16, 32>}, {transform_indices = @transform_1, window_bounds = array<i64: 16, 32>}, {pipeline_mode = #tpu.pipeline_mode<synchronous>, transform_indices = @transform_2, window_bounds = array<i64: 8, 8>}, {pipeline_mode = #tpu.pipeline_mode<synchronous>, transform_indices = @transform_3, window_bounds = array<i64: 32, 96>}, {pipeline_mode = #tpu.pipeline_mode<synchronous>, transform_indices = @transform_4, window_bounds = array<i64: 1, 96>}, {pipeline_mode = #tpu.pipeline_mode<synchronous>, transform_indices = @transform_5, window_bounds = array<i64: 32, 32>}, {pipeline_mode = #tpu.pipeline_mode<synchronous>, transform_indices = @transform_6, window_bounds = array<i64: 1, 32>}, {pipeline_mode = #tpu.pipeline_mode<synchronous>, transform_indices = @transform_7, window_bounds = array<i64: 1, 32>}, {pipeline_mode = #tpu.pipeline_mode<synchronous>, transform_indices = @transform_8, window_bounds = array<i64: 1, 32>}, {pipeline_mode = #tpu.pipeline_mode<synchronous>, transform_indices = @transform_9, window_bounds = array<i64: 32, 32>}, {pipeline_mode = #tpu.pipeline_mode<synchronous>, transform_indices = @transform_10, window_bounds = array<i64: 1, 32>}, {pipeline_mode = #tpu.pipeline_mode<synchronous>, transform_indices = @transform_11, window_bounds = array<i64: 32, 64>}, {pipeline_mode = #tpu.pipeline_mode<synchronous>, transform_indices = @transform_12, window_bounds = array<i64: 1, 64>}, {pipeline_mode = #tpu.pipeline_mode<synchronous>, transform_indices = @transform_13, window_bounds = array<i64: 32, 32>}, {pipeline_mode = #tpu.pipeline_mode<synchronous>, transform_indices = @transform_14, window_bounds = array<i64: 1, 32>}, {pipeline_mode = #tpu.pipeline_mode<synchronous>, transform_indices = @transform_15, window_bounds = array<i64: 1, 32>}, {pipeline_mode = #tpu.pipeline_mode<synchronous>, transform_indices = @transform_16, window_bounds = array<i64: 1, 32>}, {pipeline_mode = #tpu.pipeline_mode<synchronous>, transform_indices = @transform_17, window_bounds = array<i64: 32, 2048>}, {pipeline_mode = #tpu.pipeline_mode<synchronous>, transform_indices = @transform_18, window_bounds = array<i64: 1, 2048>}, {pipeline_mode = #tpu.pipeline_mode<synchronous>, transform_indices = @transform_19, window_bounds = array<i64: 2048, 32>}, {pipeline_mode = #tpu.pipeline_mode<synchronous>, transform_indices = @transform_20, window_bounds = array<i64: 1, 32>}, {pipeline_mode = #tpu.pipeline_mode<synchronous>, transform_indices = @transform_21, window_bounds = array<i64: 1, 32>}, {pipeline_mode = #tpu.pipeline_mode<synchronous>, transform_indices = @transform_22, window_bounds = array<i64: 1, 32>}, {transform_indices = @transform_23, window_bounds = array<i64: 16, 32>}]} {
    %c0 = arith.constant 0 : index
    %c0_0 = arith.constant 0 : index
    %0 = vector.load %arg1[%c0, %c0_0] : memref<16x32xf32, #tpu.memory_space<vmem>>, vector<16x32xf32>
    %c0_1 = arith.constant 0 : index
    %c0_2 = arith.constant 0 : index
    %1 = vector.load %arg2[%c0_1, %c0_2] : memref<16x32xf32, #tpu.memory_space<vmem>>, vector<16x32xf32>
    %c0_3 = arith.constant 0 : index
    %c0_4 = arith.constant 0 : index
    %2 = vector.load %arg3[%c0_3, %c0_4] : memref<8x8xf32, #tpu.memory_space<vmem>>, vector<8x8xf32>
    %3 = arith.truncf %0 : vector<16x32xf32> to vector<16x32xbf16>
    %c0_5 = arith.constant 0 : index
    %c0_6 = arith.constant 0 : index
    %4 = vector.load %arg4[%c0_5, %c0_6] : memref<32x96xbf16, #tpu.memory_space<vmem>>, vector<32x96xbf16>
    %cst = arith.constant dense<0.000000e+00> : vector<16x96xf32>
    %5 = tpu.matmul %3, %4, %cst {dimension_numbers = #tpu.dot_dimension_numbers<[1], [0], [0], [1], [0, 0, 1, 1], [], []>} : vector<16x32xbf16>, vector<32x96xbf16>, vector<16x96xf32> -> vector<16x96xf32>
    %c0_7 = arith.constant 0 : index
    %c0_8 = arith.constant 0 : index
    %6 = vector.load %arg5[%c0_7, %c0_8] : memref<1x96xf32, #tpu.memory_space<vmem>>, vector<1x96xf32>
    %7 = vector.broadcast %6 : vector<1x96xf32> to vector<16x96xf32>
    %8 = arith.addf %5, %7 : vector<16x96xf32>
    %9 = vector.extract_strided_slice %8 {offsets = [0, 0], sizes = [16, 32], strides = [1, 1]} : vector<16x96xf32> to vector<16x32xf32>
    %10 = vector.extract_strided_slice %8 {offsets = [0, 32], sizes = [16, 32], strides = [1, 1]} : vector<16x96xf32> to vector<16x32xf32>
    %11 = vector.extract_strided_slice %8 {offsets = [0, 64], sizes = [16, 32], strides = [1, 1]} : vector<16x96xf32> to vector<16x32xf32>
    %12 = vector.shape_cast %9 : vector<16x32xf32> to vector<2x8x32xf32>
    %13 = vector.extract_strided_slice %12 {offsets = [0, 0, 0], sizes = [2, 8, 8], strides = [1, 1, 1]} : vector<2x8x32xf32> to vector<2x8x8xf32>
    %14 = vector.extract_strided_slice %12 {offsets = [0, 0, 8], sizes = [2, 8, 8], strides = [1, 1, 1]} : vector<2x8x32xf32> to vector<2x8x8xf32>
    %15 = vector.extract_strided_slice %12 {offsets = [0, 0, 16], sizes = [2, 8, 8], strides = [1, 1, 1]} : vector<2x8x32xf32> to vector<2x8x8xf32>
    %16 = vector.extract_strided_slice %12 {offsets = [0, 0, 24], sizes = [2, 8, 8], strides = [1, 1, 1]} : vector<2x8x32xf32> to vector<2x8x8xf32>
    %17 = tpu.concatenate %13, %14, %15, %16 in 0 : vector<2x8x8xf32>, vector<2x8x8xf32>, vector<2x8x8xf32>, vector<2x8x8xf32> -> vector<8x8x8xf32>
    %18 = vector.shape_cast %10 : vector<16x32xf32> to vector<2x8x32xf32>
    %19 = vector.extract_strided_slice %18 {offsets = [0, 0, 0], sizes = [2, 8, 8], strides = [1, 1, 1]} : vector<2x8x32xf32> to vector<2x8x8xf32>
    %20 = vector.extract_strided_slice %18 {offsets = [0, 0, 8], sizes = [2, 8, 8], strides = [1, 1, 1]} : vector<2x8x32xf32> to vector<2x8x8xf32>
    %21 = vector.extract_strided_slice %18 {offsets = [0, 0, 16], sizes = [2, 8, 8], strides = [1, 1, 1]} : vector<2x8x32xf32> to vector<2x8x8xf32>
    %22 = vector.extract_strided_slice %18 {offsets = [0, 0, 24], sizes = [2, 8, 8], strides = [1, 1, 1]} : vector<2x8x32xf32> to vector<2x8x8xf32>
    %23 = tpu.concatenate %19, %20, %21, %22 in 0 : vector<2x8x8xf32>, vector<2x8x8xf32>, vector<2x8x8xf32>, vector<2x8x8xf32> -> vector<8x8x8xf32>
    %24 = vector.shape_cast %11 : vector<16x32xf32> to vector<2x8x32xf32>
    %25 = vector.extract_strided_slice %24 {offsets = [0, 0, 0], sizes = [2, 8, 8], strides = [1, 1, 1]} : vector<2x8x32xf32> to vector<2x8x8xf32>
    %26 = vector.extract_strided_slice %24 {offsets = [0, 0, 8], sizes = [2, 8, 8], strides = [1, 1, 1]} : vector<2x8x32xf32> to vector<2x8x8xf32>
    %27 = vector.extract_strided_slice %24 {offsets = [0, 0, 16], sizes = [2, 8, 8], strides = [1, 1, 1]} : vector<2x8x32xf32> to vector<2x8x8xf32>
    %28 = vector.extract_strided_slice %24 {offsets = [0, 0, 24], sizes = [2, 8, 8], strides = [1, 1, 1]} : vector<2x8x32xf32> to vector<2x8x8xf32>
    %29 = tpu.concatenate %25, %26, %27, %28 in 0 : vector<2x8x8xf32>, vector<2x8x8xf32>, vector<2x8x8xf32>, vector<2x8x8xf32> -> vector<8x8x8xf32>
    "tpu.trace_start"() <{level = 10 : i32, message = "bqd,bkd->bqk"}> : () -> ()
    %cst_9 = arith.constant dense<0.000000e+00> : vector<8x8x8xf32>
    %30 = tpu.matmul %17, %23, %cst_9 {dimension_numbers = #tpu.dot_dimension_numbers<[2], [2], [1], [1], [0, 0, 0, 1, 1, 1], [0], [0]>} : vector<8x8x8xf32>, vector<8x8x8xf32>, vector<8x8x8xf32> -> vector<8x8x8xf32>
    "tpu.trace_stop"() : () -> ()
    %31 = vector.shape_cast %2 : vector<8x8xf32> to vector<1x8x8xf32>
    %32 = vector.broadcast %31 : vector<1x8x8xf32> to vector<8x8x8xf32>
    %33 = arith.addf %30, %32 : vector<8x8x8xf32>
    %cst_10 = arith.constant dense<0xFF800000> : vector<8x8xf32>
    %34 = vector.multi_reduction <maximumf>, %33, %cst_10 [2] : vector<8x8x8xf32> to vector<8x8xf32>
    %35 = vector.shape_cast %34 : vector<8x8xf32> to vector<8x8x1xf32>
    %36 = vector.broadcast %35 : vector<8x8x1xf32> to vector<8x8x8xf32>
    %37 = arith.subf %33, %36 : vector<8x8x8xf32>
    %38 = math.exp %37 : vector<8x8x8xf32>
    %cst_11 = arith.constant dense<0.000000e+00> : vector<8x8xf32>
    %39 = vector.multi_reduction <add>, %38, %cst_11 [2] : vector<8x8x8xf32> to vector<8x8xf32>
    %40 = vector.shape_cast %39 : vector<8x8xf32> to vector<8x8x1xf32>
    %41 = tpu.reciprocal %40 {approx = true} : vector<8x8x1xf32> -> vector<8x8x1xf32>
    %42 = vector.broadcast %41 : vector<8x8x1xf32> to vector<8x8x8xf32>
    %43 = arith.mulf %38, %42 : vector<8x8x8xf32>
    "tpu.trace_start"() <{level = 10 : i32, message = "bqk,bkd->bqd"}> : () -> ()
    %cst_12 = arith.constant dense<0.000000e+00> : vector<8x8x8xf32>
    %44 = tpu.matmul %43, %29, %cst_12 {dimension_numbers = #tpu.dot_dimension_numbers<[2], [1], [1], [2], [0, 0, 0, 1, 1, 2], [0], [0]>} : vector<8x8x8xf32>, vector<8x8x8xf32>, vector<8x8x8xf32> -> vector<8x8x8xf32>
    "tpu.trace_stop"() : () -> ()
    %45 = vector.extract_strided_slice %44 {offsets = [0, 0, 0], sizes = [2, 8, 8], strides = [1, 1, 1]} : vector<8x8x8xf32> to vector<2x8x8xf32>
    %46 = vector.extract_strided_slice %44 {offsets = [2, 0, 0], sizes = [2, 8, 8], strides = [1, 1, 1]} : vector<8x8x8xf32> to vector<2x8x8xf32>
    %47 = vector.extract_strided_slice %44 {offsets = [4, 0, 0], sizes = [2, 8, 8], strides = [1, 1, 1]} : vector<8x8x8xf32> to vector<2x8x8xf32>
    %48 = vector.extract_strided_slice %44 {offsets = [6, 0, 0], sizes = [2, 8, 8], strides = [1, 1, 1]} : vector<8x8x8xf32> to vector<2x8x8xf32>
    %49 = tpu.concatenate %45, %46, %47, %48 in 2 : vector<2x8x8xf32>, vector<2x8x8xf32>, vector<2x8x8xf32>, vector<2x8x8xf32> -> vector<2x8x32xf32>
    %50 = vector.shape_cast %49 : vector<2x8x32xf32> to vector<16x32xf32>
    %51 = arith.truncf %50 : vector<16x32xf32> to vector<16x32xbf16>
    %c0_13 = arith.constant 0 : index
    %c0_14 = arith.constant 0 : index
    %52 = vector.load %arg6[%c0_13, %c0_14] : memref<32x32xbf16, #tpu.memory_space<vmem>>, vector<32x32xbf16>
    %cst_15 = arith.constant dense<0.000000e+00> : vector<16x32xf32>
    %53 = tpu.matmul %51, %52, %cst_15 {dimension_numbers = #tpu.dot_dimension_numbers<[1], [0], [0], [1], [0, 0, 1, 1], [], []>} : vector<16x32xbf16>, vector<32x32xbf16>, vector<16x32xf32> -> vector<16x32xf32>
    %c0_16 = arith.constant 0 : index
    %c0_17 = arith.constant 0 : index
    %54 = vector.load %arg7[%c0_16, %c0_17] : memref<1x32xf32, #tpu.memory_space<vmem>>, vector<1x32xf32>
    %55 = vector.broadcast %54 : vector<1x32xf32> to vector<16x32xf32>
    %56 = arith.addf %53, %55 : vector<16x32xf32>
    %57 = arith.addf %0, %56 : vector<16x32xf32>
    %c0_18 = arith.constant 0 : index
    %c0_19 = arith.constant 0 : index
    %58 = vector.load %arg8[%c0_18, %c0_19] : memref<1x32xf32, #tpu.memory_space<vmem>>, vector<1x32xf32>
    %c0_20 = arith.constant 0 : index
    %c0_21 = arith.constant 0 : index
    %59 = vector.load %arg9[%c0_20, %c0_21] : memref<1x32xf32, #tpu.memory_space<vmem>>, vector<1x32xf32>
    %cst_22 = arith.constant dense<0.000000e+00> : vector<16xf32>
    %60 = vector.multi_reduction <add>, %57, %cst_22 [1] : vector<16x32xf32> to vector<16xf32>
    %61 = vector.shape_cast %60 : vector<16xf32> to vector<16x1xf32>
    %cst_23 = arith.constant 3.200000e+01 : f32
    %62 = vector.broadcast %cst_23 : f32 to vector<16x1xf32>
    %63 = arith.divf %61, %62 : vector<16x1xf32>
    %64 = vector.broadcast %63 : vector<16x1xf32> to vector<16x32xf32>
    %65 = arith.subf %57, %64 : vector<16x32xf32>
    %66 = arith.mulf %65, %65 : vector<16x32xf32>
    %cst_24 = arith.constant dense<0.000000e+00> : vector<16xf32>
    %67 = vector.multi_reduction <add>, %66, %cst_24 [1] : vector<16x32xf32> to vector<16xf32>
    %68 = vector.shape_cast %67 : vector<16xf32> to vector<16x1xf32>
    %cst_25 = arith.constant 3.200000e+01 : f32
    %69 = vector.broadcast %cst_25 : f32 to vector<16x1xf32>
    %70 = arith.divf %68, %69 : vector<16x1xf32>
    %cst_26 = arith.constant 9.99999974E-6 : f32
    %71 = vector.broadcast %cst_26 : f32 to vector<16x1xf32>
    %72 = arith.addf %70, %71 : vector<16x1xf32>
    %73 = math.rsqrt %72 : vector<16x1xf32>
    %74 = vector.broadcast %73 : vector<16x1xf32> to vector<16x32xf32>
    %75 = arith.mulf %65, %74 : vector<16x32xf32>
    %76 = vector.broadcast %58 : vector<1x32xf32> to vector<16x32xf32>
    %77 = arith.mulf %75, %76 : vector<16x32xf32>
    %78 = vector.broadcast %59 : vector<1x32xf32> to vector<16x32xf32>
    %79 = arith.addf %77, %78 : vector<16x32xf32>
    %80 = arith.truncf %79 : vector<16x32xf32> to vector<16x32xbf16>
    %c0_27 = arith.constant 0 : index
    %c0_28 = arith.constant 0 : index
    %81 = vector.load %arg10[%c0_27, %c0_28] : memref<32x32xbf16, #tpu.memory_space<vmem>>, vector<32x32xbf16>
    %cst_29 = arith.constant dense<0.000000e+00> : vector<16x32xf32>
    %82 = tpu.matmul %80, %81, %cst_29 {dimension_numbers = #tpu.dot_dimension_numbers<[1], [0], [0], [1], [0, 0, 1, 1], [], []>} : vector<16x32xbf16>, vector<32x32xbf16>, vector<16x32xf32> -> vector<16x32xf32>
    %c0_30 = arith.constant 0 : index
    %c0_31 = arith.constant 0 : index
    %83 = vector.load %arg11[%c0_30, %c0_31] : memref<1x32xf32, #tpu.memory_space<vmem>>, vector<1x32xf32>
    %84 = vector.broadcast %83 : vector<1x32xf32> to vector<16x32xf32>
    %85 = arith.addf %82, %84 : vector<16x32xf32>
    %86 = arith.truncf %1 : vector<16x32xf32> to vector<16x32xbf16>
    %c0_32 = arith.constant 0 : index
    %c0_33 = arith.constant 0 : index
    %87 = vector.load %arg12[%c0_32, %c0_33] : memref<32x64xbf16, #tpu.memory_space<vmem>>, vector<32x64xbf16>
    %cst_34 = arith.constant dense<0.000000e+00> : vector<16x64xf32>
    %88 = tpu.matmul %86, %87, %cst_34 {dimension_numbers = #tpu.dot_dimension_numbers<[1], [0], [0], [1], [0, 0, 1, 1], [], []>} : vector<16x32xbf16>, vector<32x64xbf16>, vector<16x64xf32> -> vector<16x64xf32>
    %c0_35 = arith.constant 0 : index
    %c0_36 = arith.constant 0 : index
    %89 = vector.load %arg13[%c0_35, %c0_36] : memref<1x64xf32, #tpu.memory_space<vmem>>, vector<1x64xf32>
    %90 = vector.broadcast %89 : vector<1x64xf32> to vector<16x64xf32>
    %91 = arith.addf %88, %90 : vector<16x64xf32>
    %92 = vector.extract_strided_slice %91 {offsets = [0, 0], sizes = [16, 32], strides = [1, 1]} : vector<16x64xf32> to vector<16x32xf32>
    %93 = vector.extract_strided_slice %91 {offsets = [0, 32], sizes = [16, 32], strides = [1, 1]} : vector<16x64xf32> to vector<16x32xf32>
    %94 = vector.shape_cast %85 : vector<16x32xf32> to vector<2x8x32xf32>
    %95 = vector.extract_strided_slice %94 {offsets = [0, 0, 0], sizes = [2, 8, 8], strides = [1, 1, 1]} : vector<2x8x32xf32> to vector<2x8x8xf32>
    %96 = vector.extract_strided_slice %94 {offsets = [0, 0, 8], sizes = [2, 8, 8], strides = [1, 1, 1]} : vector<2x8x32xf32> to vector<2x8x8xf32>
    %97 = vector.extract_strided_slice %94 {offsets = [0, 0, 16], sizes = [2, 8, 8], strides = [1, 1, 1]} : vector<2x8x32xf32> to vector<2x8x8xf32>
    %98 = vector.extract_strided_slice %94 {offsets = [0, 0, 24], sizes = [2, 8, 8], strides = [1, 1, 1]} : vector<2x8x32xf32> to vector<2x8x8xf32>
    %99 = tpu.concatenate %95, %96, %97, %98 in 0 : vector<2x8x8xf32>, vector<2x8x8xf32>, vector<2x8x8xf32>, vector<2x8x8xf32> -> vector<8x8x8xf32>
    %100 = vector.shape_cast %92 : vector<16x32xf32> to vector<2x8x32xf32>
    %101 = vector.extract_strided_slice %100 {offsets = [0, 0, 0], sizes = [2, 8, 8], strides = [1, 1, 1]} : vector<2x8x32xf32> to vector<2x8x8xf32>
    %102 = vector.extract_strided_slice %100 {offsets = [0, 0, 8], sizes = [2, 8, 8], strides = [1, 1, 1]} : vector<2x8x32xf32> to vector<2x8x8xf32>
    %103 = vector.extract_strided_slice %100 {offsets = [0, 0, 16], sizes = [2, 8, 8], strides = [1, 1, 1]} : vector<2x8x32xf32> to vector<2x8x8xf32>
    %104 = vector.extract_strided_slice %100 {offsets = [0, 0, 24], sizes = [2, 8, 8], strides = [1, 1, 1]} : vector<2x8x32xf32> to vector<2x8x8xf32>
    %105 = tpu.concatenate %101, %102, %103, %104 in 0 : vector<2x8x8xf32>, vector<2x8x8xf32>, vector<2x8x8xf32>, vector<2x8x8xf32> -> vector<8x8x8xf32>
    %106 = vector.shape_cast %93 : vector<16x32xf32> to vector<2x8x32xf32>
    %107 = vector.extract_strided_slice %106 {offsets = [0, 0, 0], sizes = [2, 8, 8], strides = [1, 1, 1]} : vector<2x8x32xf32> to vector<2x8x8xf32>
    %108 = vector.extract_strided_slice %106 {offsets = [0, 0, 8], sizes = [2, 8, 8], strides = [1, 1, 1]} : vector<2x8x32xf32> to vector<2x8x8xf32>
    %109 = vector.extract_strided_slice %106 {offsets = [0, 0, 16], sizes = [2, 8, 8], strides = [1, 1, 1]} : vector<2x8x32xf32> to vector<2x8x8xf32>
    %110 = vector.extract_strided_slice %106 {offsets = [0, 0, 24], sizes = [2, 8, 8], strides = [1, 1, 1]} : vector<2x8x32xf32> to vector<2x8x8xf32>
    %111 = tpu.concatenate %107, %108, %109, %110 in 0 : vector<2x8x8xf32>, vector<2x8x8xf32>, vector<2x8x8xf32>, vector<2x8x8xf32> -> vector<8x8x8xf32>
    "tpu.trace_start"() <{level = 10 : i32, message = "bqd,bkd->bqk"}> : () -> ()
    %cst_37 = arith.constant dense<0.000000e+00> : vector<8x8x8xf32>
    %112 = tpu.matmul %99, %105, %cst_37 {dimension_numbers = #tpu.dot_dimension_numbers<[2], [2], [1], [1], [0, 0, 0, 1, 1, 1], [0], [0]>} : vector<8x8x8xf32>, vector<8x8x8xf32>, vector<8x8x8xf32> -> vector<8x8x8xf32>
    "tpu.trace_stop"() : () -> ()
    %cst_38 = arith.constant dense<0xFF800000> : vector<8x8xf32>
    %113 = vector.multi_reduction <maximumf>, %112, %cst_38 [2] : vector<8x8x8xf32> to vector<8x8xf32>
    %114 = vector.shape_cast %113 : vector<8x8xf32> to vector<8x8x1xf32>
    %115 = vector.broadcast %114 : vector<8x8x1xf32> to vector<8x8x8xf32>
    %116 = arith.subf %112, %115 : vector<8x8x8xf32>
    %117 = math.exp %116 : vector<8x8x8xf32>
    %cst_39 = arith.constant dense<0.000000e+00> : vector<8x8xf32>
    %118 = vector.multi_reduction <add>, %117, %cst_39 [2] : vector<8x8x8xf32> to vector<8x8xf32>
    %119 = vector.shape_cast %118 : vector<8x8xf32> to vector<8x8x1xf32>
    %120 = tpu.reciprocal %119 {approx = true} : vector<8x8x1xf32> -> vector<8x8x1xf32>
    %121 = vector.broadcast %120 : vector<8x8x1xf32> to vector<8x8x8xf32>
    %122 = arith.mulf %117, %121 : vector<8x8x8xf32>
    "tpu.trace_start"() <{level = 10 : i32, message = "bqk,bkd->bqd"}> : () -> ()
    %cst_40 = arith.constant dense<0.000000e+00> : vector<8x8x8xf32>
    %123 = tpu.matmul %122, %111, %cst_40 {dimension_numbers = #tpu.dot_dimension_numbers<[2], [1], [1], [2], [0, 0, 0, 1, 1, 2], [0], [0]>} : vector<8x8x8xf32>, vector<8x8x8xf32>, vector<8x8x8xf32> -> vector<8x8x8xf32>
    "tpu.trace_stop"() : () -> ()
    %124 = vector.extract_strided_slice %123 {offsets = [0, 0, 0], sizes = [2, 8, 8], strides = [1, 1, 1]} : vector<8x8x8xf32> to vector<2x8x8xf32>
    %125 = vector.extract_strided_slice %123 {offsets = [2, 0, 0], sizes = [2, 8, 8], strides = [1, 1, 1]} : vector<8x8x8xf32> to vector<2x8x8xf32>
    %126 = vector.extract_strided_slice %123 {offsets = [4, 0, 0], sizes = [2, 8, 8], strides = [1, 1, 1]} : vector<8x8x8xf32> to vector<2x8x8xf32>
    %127 = vector.extract_strided_slice %123 {offsets = [6, 0, 0], sizes = [2, 8, 8], strides = [1, 1, 1]} : vector<8x8x8xf32> to vector<2x8x8xf32>
    %128 = tpu.concatenate %124, %125, %126, %127 in 2 : vector<2x8x8xf32>, vector<2x8x8xf32>, vector<2x8x8xf32>, vector<2x8x8xf32> -> vector<2x8x32xf32>
    %129 = vector.shape_cast %128 : vector<2x8x32xf32> to vector<16x32xf32>
    %130 = arith.truncf %129 : vector<16x32xf32> to vector<16x32xbf16>
    %c0_41 = arith.constant 0 : index
    %c0_42 = arith.constant 0 : index
    %131 = vector.load %arg14[%c0_41, %c0_42] : memref<32x32xbf16, #tpu.memory_space<vmem>>, vector<32x32xbf16>
    %cst_43 = arith.constant dense<0.000000e+00> : vector<16x32xf32>
    %132 = tpu.matmul %130, %131, %cst_43 {dimension_numbers = #tpu.dot_dimension_numbers<[1], [0], [0], [1], [0, 0, 1, 1], [], []>} : vector<16x32xbf16>, vector<32x32xbf16>, vector<16x32xf32> -> vector<16x32xf32>
    %c0_44 = arith.constant 0 : index
    %c0_45 = arith.constant 0 : index
    %133 = vector.load %arg15[%c0_44, %c0_45] : memref<1x32xf32, #tpu.memory_space<vmem>>, vector<1x32xf32>
    %134 = vector.broadcast %133 : vector<1x32xf32> to vector<16x32xf32>
    %135 = arith.addf %132, %134 : vector<16x32xf32>
    %136 = arith.addf %79, %135 : vector<16x32xf32>
    %c0_46 = arith.constant 0 : index
    %c0_47 = arith.constant 0 : index
    %137 = vector.load %arg16[%c0_46, %c0_47] : memref<1x32xf32, #tpu.memory_space<vmem>>, vector<1x32xf32>
    %c0_48 = arith.constant 0 : index
    %c0_49 = arith.constant 0 : index
    %138 = vector.load %arg17[%c0_48, %c0_49] : memref<1x32xf32, #tpu.memory_space<vmem>>, vector<1x32xf32>
    %cst_50 = arith.constant dense<0.000000e+00> : vector<16xf32>
    %139 = vector.multi_reduction <add>, %136, %cst_50 [1] : vector<16x32xf32> to vector<16xf32>
    %140 = vector.shape_cast %139 : vector<16xf32> to vector<16x1xf32>
    %cst_51 = arith.constant 3.200000e+01 : f32
    %141 = vector.broadcast %cst_51 : f32 to vector<16x1xf32>
    %142 = arith.divf %140, %141 : vector<16x1xf32>
    %143 = vector.broadcast %142 : vector<16x1xf32> to vector<16x32xf32>
    %144 = arith.subf %136, %143 : vector<16x32xf32>
    %145 = arith.mulf %144, %144 : vector<16x32xf32>
    %cst_52 = arith.constant dense<0.000000e+00> : vector<16xf32>
    %146 = vector.multi_reduction <add>, %145, %cst_52 [1] : vector<16x32xf32> to vector<16xf32>
    %147 = vector.shape_cast %146 : vector<16xf32> to vector<16x1xf32>
    %cst_53 = arith.constant 3.200000e+01 : f32
    %148 = vector.broadcast %cst_53 : f32 to vector<16x1xf32>
    %149 = arith.divf %147, %148 : vector<16x1xf32>
    %cst_54 = arith.constant 9.99999974E-6 : f32
    %150 = vector.broadcast %cst_54 : f32 to vector<16x1xf32>
    %151 = arith.addf %149, %150 : vector<16x1xf32>
    %152 = math.rsqrt %151 : vector<16x1xf32>
    %153 = vector.broadcast %152 : vector<16x1xf32> to vector<16x32xf32>
    %154 = arith.mulf %144, %153 : vector<16x32xf32>
    %155 = vector.broadcast %137 : vector<1x32xf32> to vector<16x32xf32>
    %156 = arith.mulf %154, %155 : vector<16x32xf32>
    %157 = vector.broadcast %138 : vector<1x32xf32> to vector<16x32xf32>
    %158 = arith.addf %156, %157 : vector<16x32xf32>
    %159 = arith.truncf %158 : vector<16x32xf32> to vector<16x32xbf16>
    %c0_55 = arith.constant 0 : index
    %c0_56 = arith.constant 0 : index
    %160 = vector.load %arg18[%c0_55, %c0_56] : memref<32x2048xbf16, #tpu.memory_space<vmem>>, vector<32x2048xbf16>
    %cst_57 = arith.constant dense<0.000000e+00> : vector<16x2048xf32>
    %161 = tpu.matmul %159, %160, %cst_57 {dimension_numbers = #tpu.dot_dimension_numbers<[1], [0], [0], [1], [0, 0, 1, 1], [], []>} : vector<16x32xbf16>, vector<32x2048xbf16>, vector<16x2048xf32> -> vector<16x2048xf32>
    %c0_58 = arith.constant 0 : index
    %c0_59 = arith.constant 0 : index
    %162 = vector.load %arg19[%c0_58, %c0_59] : memref<1x2048xf32, #tpu.memory_space<vmem>>, vector<1x2048xf32>
    %163 = vector.broadcast %162 : vector<1x2048xf32> to vector<16x2048xf32>
    %164 = arith.addf %161, %163 : vector<16x2048xf32>
    %165 = arith.truncf %164 : vector<16x2048xf32> to vector<16x2048xbf16>
    %c0_60 = arith.constant 0 : index
    %c0_61 = arith.constant 0 : index
    %166 = vector.load %arg20[%c0_60, %c0_61] : memref<2048x32xbf16, #tpu.memory_space<vmem>>, vector<2048x32xbf16>
    %cst_62 = arith.constant dense<0.000000e+00> : vector<16x32xf32>
    %167 = tpu.matmul %165, %166, %cst_62 {dimension_numbers = #tpu.dot_dimension_numbers<[1], [0], [0], [1], [0, 0, 1, 1], [], []>} : vector<16x2048xbf16>, vector<2048x32xbf16>, vector<16x32xf32> -> vector<16x32xf32>
    %c0_63 = arith.constant 0 : index
    %c0_64 = arith.constant 0 : index
    %168 = vector.load %arg21[%c0_63, %c0_64] : memref<1x32xf32, #tpu.memory_space<vmem>>, vector<1x32xf32>
    %169 = vector.broadcast %168 : vector<1x32xf32> to vector<16x32xf32>
    %170 = arith.addf %167, %169 : vector<16x32xf32>
    %171 = arith.addf %158, %170 : vector<16x32xf32>
    %c0_65 = arith.constant 0 : index
    %c0_66 = arith.constant 0 : index
    %172 = vector.load %arg22[%c0_65, %c0_66] : memref<1x32xf32, #tpu.memory_space<vmem>>, vector<1x32xf32>
    %c0_67 = arith.constant 0 : index
    %c0_68 = arith.constant 0 : index
    %173 = vector.load %arg23[%c0_67, %c0_68] : memref<1x32xf32, #tpu.memory_space<vmem>>, vector<1x32xf32>
    %cst_69 = arith.constant dense<0.000000e+00> : vector<16xf32>
    %174 = vector.multi_reduction <add>, %171, %cst_69 [1] : vector<16x32xf32> to vector<16xf32>
    %175 = vector.shape_cast %174 : vector<16xf32> to vector<16x1xf32>
    %cst_70 = arith.constant 3.200000e+01 : f32
    %176 = vector.broadcast %cst_70 : f32 to vector<16x1xf32>
    %177 = arith.divf %175, %176 : vector<16x1xf32>
    %178 = vector.broadcast %177 : vector<16x1xf32> to vector<16x32xf32>
    %179 = arith.subf %171, %178 : vector<16x32xf32>
    %180 = arith.mulf %179, %179 : vector<16x32xf32>
    %cst_71 = arith.constant dense<0.000000e+00> : vector<16xf32>
    %181 = vector.multi_reduction <add>, %180, %cst_71 [1] : vector<16x32xf32> to vector<16xf32>
    %182 = vector.shape_cast %181 : vector<16xf32> to vector<16x1xf32>
    %cst_72 = arith.constant 3.200000e+01 : f32
    %183 = vector.broadcast %cst_72 : f32 to vector<16x1xf32>
    %184 = arith.divf %182, %183 : vector<16x1xf32>
    %cst_73 = arith.constant 9.99999974E-6 : f32
    %185 = vector.broadcast %cst_73 : f32 to vector<16x1xf32>
    %186 = arith.addf %184, %185 : vector<16x1xf32>
    %187 = math.rsqrt %186 : vector<16x1xf32>
    %188 = vector.broadcast %187 : vector<16x1xf32> to vector<16x32xf32>
    %189 = arith.mulf %179, %188 : vector<16x32xf32>
    %190 = vector.broadcast %172 : vector<1x32xf32> to vector<16x32xf32>
    %191 = arith.mulf %189, %190 : vector<16x32xf32>
    %192 = vector.broadcast %173 : vector<1x32xf32> to vector<16x32xf32>
    %193 = arith.addf %191, %192 : vector<16x32xf32>
    %c0_74 = arith.constant 0 : index
    %c0_75 = arith.constant 0 : index
    %194 = vector.load %arg24[%c0_74, %c0_75] : memref<16x32xf32, #tpu.memory_space<vmem>>, vector<16x32xf32>
    tpu.vector_store %arg24[%c0_74, %c0_75], %193 {strides = array<i32>} : memref<16x32xf32, #tpu.memory_space<vmem>>, vector<16x32xf32>,
    return
  }
  func.func @transform_0(%arg0: i32) -> (i32, i32) {
    %c0_i32 = arith.constant 0 : i32
    %c0_i32_0 = arith.constant 0 : i32
    return %arg0, %c0_i32 : i32, i32
  }
  func.func @transform_1(%arg0: i32) -> (i32, i32) {
    %c0_i32 = arith.constant 0 : i32
    %c0_i32_0 = arith.constant 0 : i32
    return %arg0, %c0_i32 : i32, i32
  }
  func.func @transform_2(%arg0: i32) -> (i32, i32) {
    %c0_i32 = arith.constant 0 : i32
    %c0_i32_0 = arith.constant 0 : i32
    %c0_i32_1 = arith.constant 0 : i32
    return %c0_i32, %c0_i32_0 : i32, i32
  }
  func.func @transform_3(%arg0: i32) -> (i32, i32) {
    %c0_i32 = arith.constant 0 : i32
    %c0_i32_0 = arith.constant 0 : i32
    %c0_i32_1 = arith.constant 0 : i32
    return %c0_i32, %c0_i32_0 : i32, i32
  }
  func.func @transform_4(%arg0: i32) -> (i32, i32) {
    %c0_i32 = arith.constant 0 : i32
    %c0_i32_0 = arith.constant 0 : i32
    %c0_i32_1 = arith.constant 0 : i32
    return %c0_i32, %c0_i32_0 : i32, i32
  }
  func.func @transform_5(%arg0: i32) -> (i32, i32) {
    %c0_i32 = arith.constant 0 : i32
    %c0_i32_0 = arith.constant 0 : i32
    %c0_i32_1 = arith.constant 0 : i32
    return %c0_i32, %c0_i32_0 : i32, i32
  }
  func.func @transform_6(%arg0: i32) -> (i32, i32) {
    %c0_i32 = arith.constant 0 : i32
    %c0_i32_0 = arith.constant 0 : i32
    %c0_i32_1 = arith.constant 0 : i32
    return %c0_i32, %c0_i32_0 : i32, i32
  }
  func.func @transform_7(%arg0: i32) -> (i32, i32) {
    %c0_i32 = arith.constant 0 : i32
    %c0_i32_0 = arith.constant 0 : i32
    %c0_i32_1 = arith.constant 0 : i32
    return %c0_i32, %c0_i32_0 : i32, i32
  }
  func.func @transform_8(%arg0: i32) -> (i32, i32) {
    %c0_i32 = arith.constant 0 : i32
    %c0_i32_0 = arith.constant 0 : i32
    %c0_i32_1 = arith.constant 0 : i32
    return %c0_i32, %c0_i32_0 : i32, i32
  }
  func.func @transform_9(%arg0: i32) -> (i32, i32) {
    %c0_i32 = arith.constant 0 : i32
    %c0_i32_0 = arith.constant 0 : i32
    %c0_i32_1 = arith.constant 0 : i32
    return %c0_i32, %c0_i32_0 : i32, i32
  }
  func.func @transform_10(%arg0: i32) -> (i32, i32) {
    %c0_i32 = arith.constant 0 : i32
    %c0_i32_0 = arith.constant 0 : i32
    %c0_i32_1 = arith.constant 0 : i32
    return %c0_i32, %c0_i32_0 : i32, i32
  }
  func.func @transform_11(%arg0: i32) -> (i32, i32) {
    %c0_i32 = arith.constant 0 : i32
    %c0_i32_0 = arith.constant 0 : i32
    %c0_i32_1 = arith.constant 0 : i32
    return %c0_i32, %c0_i32_0 : i32, i32
  }
  func.func @transform_12(%arg0: i32) -> (i32, i32) {
    %c0_i32 = arith.constant 0 : i32
    %c0_i32_0 = arith.constant 0 : i32
    %c0_i32_1 = arith.constant 0 : i32
    return %c0_i32, %c0_i32_0 : i32, i32
  }
  func.func @transform_13(%arg0: i32) -> (i32, i32) {
    %c0_i32 = arith.constant 0 : i32
    %c0_i32_0 = arith.constant 0 : i32
    %c0_i32_1 = arith.constant 0 : i32
    return %c0_i32, %c0_i32_0 : i32, i32
  }
  func.func @transform_14(%arg0: i32) -> (i32, i32) {
    %c0_i32 = arith.constant 0 : i32
    %c0_i32_0 = arith.constant 0 : i32
    %c0_i32_1 = arith.constant 0 : i32
    return %c0_i32, %c0_i32_0 : i32, i32
  }
  func.func @transform_15(%arg0: i32) -> (i32, i32) {
    %c0_i32 = arith.constant 0 : i32
    %c0_i32_0 = arith.constant 0 : i32
    %c0_i32_1 = arith.constant 0 : i32
    return %c0_i32, %c0_i32_0 : i32, i32
  }
  func.func @transform_16(%arg0: i32) -> (i32, i32) {
    %c0_i32 = arith.constant 0 : i32
    %c0_i32_0 = arith.constant 0 : i32
    %c0_i32_1 = arith.constant 0 : i32
    return %c0_i32, %c0_i32_0 : i32, i32
  }
  func.func @transform_17(%arg0: i32) -> (i32, i32) {
    %c0_i32 = arith.constant 0 : i32
    %c0_i32_0 = arith.constant 0 : i32
    %c0_i32_1 = arith.constant 0 : i32
    return %c0_i32, %c0_i32_0 : i32, i32
  }
  func.func @transform_18(%arg0: i32) -> (i32, i32) {
    %c0_i32 = arith.constant 0 : i32
    %c0_i32_0 = arith.constant 0 : i32
    %c0_i32_1 = arith.constant 0 : i32
    return %c0_i32, %c0_i32_0 : i32, i32
  }
  func.func @transform_19(%arg0: i32) -> (i32, i32) {
    %c0_i32 = arith.constant 0 : i32
    %c0_i32_0 = arith.constant 0 : i32
    %c0_i32_1 = arith.constant 0 : i32
    return %c0_i32, %c0_i32_0 : i32, i32
  }
  func.func @transform_20(%arg0: i32) -> (i32, i32) {
    %c0_i32 = arith.constant 0 : i32
    %c0_i32_0 = arith.constant 0 : i32
    %c0_i32_1 = arith.constant 0 : i32
    return %c0_i32, %c0_i32_0 : i32, i32
  }
  func.func @transform_21(%arg0: i32) -> (i32, i32) {
    %c0_i32 = arith.constant 0 : i32
    %c0_i32_0 = arith.constant 0 : i32
    %c0_i32_1 = arith.constant 0 : i32
    return %c0_i32, %c0_i32_0 : i32, i32
  }
  func.func @transform_22(%arg0: i32) -> (i32, i32) {
    %c0_i32 = arith.constant 0 : i32
    %c0_i32_0 = arith.constant 0 : i32
    %c0_i32_1 = arith.constant 0 : i32
    return %c0_i32, %c0_i32_0 : i32, i32
  }
  func.func @transform_23(%arg0: i32) -> (i32, i32) {
    %c0_i32 = arith.constant 0 : i32
    %c0_i32_0 = arith.constant 0 : i32
    return %arg0, %c0_i32 : i32, i32
  }
}

</mosaic_0001>

<bundles_post_ra>
// kernel: tpu_custom_call.1
= control target key start
LH: loop header
LB: loop body
LE: loop exit
PB: predicated region body
PF: predicated region fallthrough
CT: control target
= control target key end

     0   :  { %s5586_s0 = inlined_call_operand.vmem [shape: f32[16,32], index: 0, kind: input, shape index: {}]   ;;  %s5587_s1 = inlined_call_operand.vmem [shape: f32[16,32], index: 1, kind: input, shape index: {}]   ;;  %s5588_s2 = inlined_call_operand.vmem [shape: f32[8,8], index: 2, kind: input, shape index: {}]   ;;  %s5589_s3 = inlined_call_operand.vmem [shape: bf16[32,96], index: 3, kind: input, shape index: {}]   ;;  %s5590_s4 = inlined_call_operand.vmem [shape: f32[1,96], index: 4, kind: input, shape index: {}]   ;;  %s5591_s5 = inlined_call_operand.vmem [shape: bf16[32,32], index: 5, kind: input, shape index: {}]   ;;  %s5592_s6 = inlined_call_operand.vmem [shape: f32[1,32], index: 6, kind: input, shape index: {}]   ;;  %s5593_s7 = inlined_call_operand.vmem [shape: f32[1,32], index: 7, kind: input, shape index: {}]   ;;  %s5594_s8 = inlined_call_operand.vmem [shape: f32[1,32], index: 8, kind: input, shape index: {}]   ;;  %s5595_s9 = inlined_call_operand.vmem [shape: bf16[32,32], index: 9, kind: input, shape index: {}]   ;;  %s5596_s10 = inlined_call_operand.vmem [shape: f32[1,32], index: 10, kind: input, shape index: {}]   ;;  %s5597_s11 = inlined_call_operand.vmem [shape: bf16[32,64], index: 11, kind: input, shape index: {}]   ;;  %s5598_s12 = inlined_call_operand.vmem [shape: f32[1,64], index: 12, kind: input, shape index: {}]   ;;  %s5599_s13 = inlined_call_operand.vmem [shape: bf16[32,32], index: 13, kind: input, shape index: {}]   ;;  %s5600_s14 = inlined_call_operand.vmem [shape: f32[1,32], index: 14, kind: input, shape index: {}]   ;;  %s5601_s15 = inlined_call_operand.vmem [shape: f32[1,32], index: 15, kind: input, shape index: {}]   ;;  %s5602_s16 = inlined_call_operand.vmem [shape: f32[1,32], index: 16, kind: input, shape index: {}]   ;;  %s5603_s17 = inlined_call_operand.vmem [shape: bf16[32,2048], index: 17, kind: input, shape index: {}]   ;;  %s5604_s18 = inlined_call_operand.vmem [shape: f32[1,2048], index: 18, kind: input, shape index: {}]   ;;  %s5605_s19 = inlined_call_operand.vmem [shape: bf16[2048,32], index: 19, kind: input, shape index: {}]   ;;  %s5606_s20 = inlined_call_operand.vmem [shape: f32[1,32], index: 20, kind: input, shape index: {}]   ;;  %s5607_s21 = inlined_call_operand.vmem [shape: f32[1,32], index: 21, kind: input, shape index: {}]   ;;  %s5608_s22 = inlined_call_operand.vmem [shape: f32[1,32], index: 22, kind: input, shape index: {}]   ;;  %s5609_s23 = inlined_call_operand.hbm [shape: f32[16,32], index: 23, kind: output, shape index: {}]  }
   0x1   :  { %5615 = sst [smem:[#allocation5_spill]] %s5586_s0 }
   0x2   :  { %5616 = sst [smem:[#allocation6_spill]] %s5587_s1 }
   0x3   :  { %5617 = sst [smem:[#allocation7_spill]] %s5588_s2 }
   0x4   :  { %5618 = sst [smem:[#allocation8_spill]] %s5589_s3 }
   0x5   :  { %5619 = sst [smem:[#allocation9_spill]] %s5590_s4 }
   0x6   :  { %5620 = sst [smem:[#allocation10_spill]] %s5591_s5 }
   0x7   :  { %5621 = sst [smem:[#allocation11_spill]] %s5592_s6 }
   0x8   :  { %5622 = sst [smem:[#allocation12_spill]] %s5593_s7 }
   0x9   :  { %s5623_s24 = sld [smem:[#allocation8_spill]] }
   0xa   :  { %s5624_s2 = sld [smem:[#allocation5_spill]] }
   0xf   :  { %v4044_v0 = vld [vmem:[%s5623_s24 + $0x8] sm:$0xff]  ;;  %v4043_v1 = vld [vmem:[%s5623_s24] sm:$0xff] }
  0x10   :  { %v4550_v2 = vld [vmem:[%s5624_s2] sm:$0xff]  ;;  %v4555_v3 = vld [vmem:[%s5624_s2 + $0x8] sm:$0xff]  ;;  %112 = vmatpush.bf16.msra.mxu0 %v4044_v0 }
  0x11   :  { %v81_v4 = vpack.c.bf16 %v4555_v3, %v4550_v2 }
  0x12   :  { %28 = vsyncpa [#allocation3], 0  ;;  %vm102_vm0 = vcmask 261120   ;;  %s5625_s29 = sld [smem:[#allocation9_spill]]  ;;  %s4410_s3 = smov 112   ;;  %vm136_vm1 = vcmask 64512  }
  0x13   :  { %s4411_s0 = smov 120   ;;  %s4412_s4 = smov 104   ;;  %vm665_vm2 = vcmask 130048   ;;  %vm668_vm3 = vcmask 195584  }
  0x14   :  { %113 = vmatpush.bf16.msra.mxu0 %v4043_v1  ;;  %s4413_s30 = smov 96   ;;  %s5626_s5 = sld [smem:[#allocation7_spill]] }
  0x15   :  { %s4414_s1 = smov 64   ;;  %s4415_s26 = smov 8  }
  0x16   :  { %s4416_s2 = smov 24   ;;  %s5614_s6 = smov 16  }
  0x17   :  { %3302 = vmatmul.msk.bf16.vlgmr.msra.gmra.mxu0 %vm102_vm0, %v81_v4  ;;  %s5627_s28 = sld [smem:[#allocation10_spill]] }
  0x18   :  { %v4294_v5 = vld [vmem:[%s5625_s29] ss:$0 sm:$0xff]  ;;  %s5630_s24 = sld [smem:[#allocation12_spill]] }
  0x1a   :  { %v80_v24 = vld [vmem:[%s5626_s5] sm:$0xff]  ;;  %s5629_s5 = sld [smem:[#allocation6_spill]] }
  0x94   :  { %v115_v6 = vpop.f32.mrf.mxu0 }
  0x95   :  { %v4563_v7 = vadd.f32 %v4294_v5, %v115_v6 }
  0x97   :  { %126 = vrot.lane.b32.xlu0 %v4563_v7, %s4410_s3 }
  0x9c   :  { %v117_v8 = vpop.f32.mrf.mxu0 }
  0x9d   :  { %v4567_v9 = vadd.f32 %v4294_v5, %v117_v8 }
  0x9f   :  { %128 = vrot.lane.b32.xlu2 %v4567_v9, %s4410_s3  ;;  %124 = vrot.lane.b32.xlu1 %v4567_v9, %s4411_s0 }
  0xa0   :  { %122 = vrot.lane.b32.xlu0 %v4563_v7, %s4411_s0 }
  0xa7   :  { %132 = vrot.lane.b32.xlu1 %v4567_v9, %s4412_s4  ;;  %130 = vrot.lane.b32.xlu2 %v4563_v7, %s4412_s4 }
  0xa8   :  { %134 = vrot.lane.b32.xlu0 %v4563_v7, %s4413_s30 }
  0xaf   :  { %161 = vrot.lane.b32.xlu1 %v4567_v9, %s4413_s30 }
  0xf9   :  { %v4587_v11 = vpop.permute.xlu2 %128 }
 0x101   :  { %v4597_v14 = vpop.permute.xlu2 %130 }
 0x109   :  { %v4583_v10 = vpop.permute.xlu0 %126 }
 0x10a   :  { %239 = vrot.lane.b32.xlu2 %v4583_v10, %s4413_s30 }
 0x111   :  { %v4589_v12 = vpop.permute.xlu1 %124 }
 0x112   :  { %v4591_v13 = vpop.permute.xlu0 %122  ;;  %213 = vrot.lane.b32.xlu1 %v4589_v12, %s4413_s30  ;;  %v4224_v51 = vpack.i.bf16 %v4589_v12, %v4563_v7 }
 0x113   :  { %187 = vrot.lane.b32.xlu0 %v4591_v13, %s4413_s30 }
 0x119   :  { %v4599_v15 = vpop.permute.xlu1 %132 }
 0x11a   :  { %v135_v16 = vpop.permute.xlu0 %134  ;;  %291 = vrot.lane.b32.xlu1 %v4597_v14, %s4413_s30  ;;  %317 = vrot.lane.b32.xlu2 %v4599_v15, %s4413_s30 }
 0x11b   :  { %265 = vrot.lane.b32.xlu0 %v4587_v11, %s4413_s30  ;;  %3303 = vmatpush.xpose.msk.msra.mxu2 %vm136_vm1, %v135_v16 }
 0x11e   :  { %3304 = vmatmul.msk.f32.vlgmr.msra.gmra.mxu2 %vm136_vm1, %v4563_v7 }
 0x121   :  { %v162_v17 = vpop.permute.xlu1 %161 }
 0x122   :  { %3305 = vmatpush.xpose.msk.msrb.mxu2 %vm136_vm1, %v162_v17 }
 0x126   :  { %3306 = vmatmul.msk.f32.vlgmr.msrb.gmra.mxu2 %vm136_vm1, %v4567_v9 }
 0x164   :  { %v240_v18 = vpop.permute.xlu2 %239 }
 0x165   :  { %3311 = vmatpush.xpose.msk.msra.mxu2 %vm136_vm1, %v240_v18 }
 0x168   :  { %3312 = vmatmul.msk.f32.vlgmr.msra.gmra.mxu2 %vm136_vm1, %v4583_v10 }
 0x174   :  { %v318_v19 = vpop.permute.xlu2 %317 }
 0x175   :  { %3317 = vmatpush.xpose.msk.msrb.mxu2 %vm136_vm1, %v318_v19 }
 0x178   :  { %3318 = vmatmul.msk.f32.vlgmr.msrb.gmra.mxu2 %vm136_vm1, %v4599_v15 }
 0x184   :  { %v214_v20 = vpop.permute.xlu1 %213 }
 0x185   :  { %v188_v21 = vpop.permute.xlu0 %187  ;;  %3309 = vmatpush.xpose.msk.msra.mxu1 %vm136_vm1, %v214_v20 }
 0x186   :  { %3307 = vmatpush.xpose.msk.msra.mxu3 %vm136_vm1, %v188_v21 }
 0x188   :  { %3310 = vmatmul.msk.f32.vlgmr.msra.gmra.mxu1 %vm136_vm1, %v4589_v12 }
 0x189   :  { %3308 = vmatmul.msk.f32.vlgmr.msra.gmra.mxu3 %vm136_vm1, %v4591_v13 }
 0x18c   :  { %v292_v22 = vpop.permute.xlu1 %291 }
 0x18d   :  { %v266_v23 = vpop.permute.xlu0 %265  ;;  %3315 = vmatpush.xpose.msk.msrb.mxu1 %vm136_vm1, %v292_v22 }
 0x18e   :  { %3313 = vmatpush.xpose.msk.msrb.mxu3 %vm136_vm1, %v266_v23 }
 0x190   :  { %3316 = vmatmul.msk.f32.vlgmr.msrb.gmra.mxu1 %vm136_vm1, %v4597_v14 }
 0x191   :  { %3314 = vmatmul.msk.f32.vlgmr.msrb.gmra.mxu3 %vm136_vm1, %v4587_v11 }
 0x1a1   :  { %v158_v25 = vpop.f32.mrf.mxu2 }
 0x1a2   :  { %v159_v26 = vadd.f32 %v158_v25, %v80_v24 }
 0x1a4   :  { %v343_v27 = vsel %vm136_vm1, %v159_v26, -inf }
 0x1a5   :  { %344 = vmax.xlane.f32.xlu2 %v343_v27 }
 0x1a9   :  { %v184_v28 = vpop.f32.mrf.mxu2 }
 0x1aa   :  { %v185_v29 = vadd.f32 %v184_v28, %v80_v24 }
 0x1ac   :  { %v346_v30 = vsel %vm136_vm1, %v185_v29, -inf }
 0x1ad   :  { %347 = vmax.xlane.f32.xlu1 %v346_v30 }
 0x1eb   :  { %v262_v31 = vpop.f32.mrf.mxu2 }
 0x1ec   :  { %v263_v41 = vadd.f32 %v262_v31, %v80_v24 }
 0x1ee   :  { %v355_v44 = vsel %vm136_vm1, %v263_v41, -inf }
 0x1fb   :  { %v340_v35 = vpop.f32.mrf.mxu2 }
 0x1fc   :  { %v341_v36 = vadd.f32 %v340_v35, %v80_v24  ;;  %v4239_v35 = vpack.i.bf16 %v4597_v14, %v4587_v11 }
 0x1fe   :  { %v364_v40 = vsel %vm136_vm1, %v341_v36, -inf }
 0x205   :  { %v236_v32 = vpop.f32.mrf.mxu1 }
 0x206   :  { %v237_v33 = vadd.f32 %v236_v32, %v80_v24 }
 0x208   :  { %v352_v34 = vsel %vm136_vm1, %v237_v33, -inf }
 0x209   :  { %353 = vmax.xlane.f32.xlu0 %v352_v34 }
 0x20c   :  { %v210_v37 = vpop.f32.mrf.mxu3 }
 0x20d   :  { %v211_v38 = vadd.f32 %v210_v37, %v80_v24  ;;  %v314_v46 = vpop.f32.mrf.mxu1 }
 0x20e   :  { %v315_v47 = vadd.f32 %v314_v46, %v80_v24 }
 0x20f   :  { %v349_v39 = vsel %vm136_vm1, %v211_v38, -inf }
 0x210   :  { %350 = vmax.xlane.f32.xlu2 %v349_v39  ;;  %v361_v48 = vsel %vm136_vm1, %v315_v47, -inf  ;;  %v4229_v39 = vpack.i.bf16 %v4591_v13, %v4567_v9 }
 0x211   :  { %365 = vmax.xlane.f32.xlu0 %v364_v40 }
 0x214   :  { %v288_v42 = vpop.f32.mrf.mxu3 }
 0x215   :  { %v289_v43 = vadd.f32 %v288_v42, %v80_v24 }
 0x217   :  { %v358_v45 = vsel %vm136_vm1, %v289_v43, -inf }
 0x218   :  { %356 = vmax.xlane.f32.xlu2 %v355_v44  ;;  %359 = vmax.xlane.f32.xlu1 %v358_v45  ;;  %v345_v55 = vpop.xlane.xlu2 %344 }
 0x219   :  { %v367_v56 = vsub.f32 %v159_v26, %v345_v55 }
 0x21b   :  { %v375_v57 = vmul.f32 1.442695, %v367_v56 }
 0x220   :  { %v348_v49 = vpop.xlane.xlu1 %347  ;;  %362 = vmax.xlane.f32.xlu2 %v361_v48 }
 0x221   :  { %v368_v50 = vsub.f32 %v185_v29, %v348_v49 }
 0x223   :  { %v377_v52 = vmul.f32 1.442695, %v368_v50 }
 0x225   :  { %4306 = vpow2.f32 %v377_v52  ;;  %4225 = vrot.lane.b32.xlu0 %v4224_v51, %s4414_s1 }
 0x226   :  { %4308 = vpow2.f32 %v375_v57 }
 0x22b   :  { %v4645_v53 = vpop.eup %4306 }
 0x22c   :  { %v394_v54 = vsel %vm136_vm1, %v4645_v53, 0.0  ;;  %v4309_v58 = vpop.eup %4308 }
 0x22d   :  { %395 = vadd.xlane.f32.xlu2 %v394_v54  ;;  %v391_v59 = vsel %vm136_vm1, %v4309_v58, 0.0 }
 0x24f   :  { %392 = vadd.xlane.f32.xlu0 %v391_v59 }
 0x27c   :  { %v354_v60 = vpop.xlane.xlu0 %353 }
 0x27d   :  { %v370_v8 = vsub.f32 %v237_v33, %v354_v60 }
 0x27f   :  { %v381_v19 = vmul.f32 1.442695, %v370_v8 }
 0x283   :  { %v351_v61 = vpop.xlane.xlu2 %350 }
 0x284   :  { %v369_v62 = vsub.f32 %v211_v38, %v351_v61  ;;  %v366_v63 = vpop.xlane.xlu0 %365  ;;  %v4234_v38 = vpack.i.bf16 %v4599_v15, %v4583_v10 }
 0x285   :  { %v374_v0 = vsub.f32 %v341_v36, %v366_v63 }
 0x286   :  { %v379_v1 = vmul.f32 1.442695, %v369_v62 }
 0x287   :  { %v389_v4 = vmul.f32 1.442695, %v374_v0 }
 0x288   :  { %4310 = vpow2.f32 %v379_v1 }
 0x289   :  { %4312 = vpow2.f32 %v389_v4 }
 0x28b   :  { %v357_v5 = vpop.xlane.xlu2 %356  ;;  %v360_v20 = vpop.xlane.xlu1 %359 }
 0x28c   :  { %v371_v6 = vsub.f32 %v263_v41, %v357_v5  ;;  %v372_v24 = vsub.f32 %v289_v43, %v360_v20 }
 0x28e   :  { %v4650_v7 = vpop.eup %4310  ;;  %v383_v12 = vmul.f32 1.442695, %v371_v6  ;;  %v385_v30 = vmul.f32 1.442695, %v372_v24 }
 0x28f   :  { %v4652_v16 = vpop.eup %4312  ;;  %v397_v17 = vsel %vm136_vm1, %v4650_v7, 0.0 }
 0x290   :  { %4314 = vpow2.f32 %v383_v12  ;;  %398 = vadd.xlane.f32.xlu0 %v397_v17  ;;  %v412_v18 = vsel %vm136_vm1, %v4652_v16, 0.0 }
 0x291   :  { %413 = vadd.xlane.f32.xlu2 %v412_v18  ;;  %4316 = vpow2.f32 %v381_v19 }
 0x293   :  { %v363_v21 = vpop.xlane.xlu2 %362 }
 0x294   :  { %v373_v22 = vsub.f32 %v315_v47, %v363_v21 }
 0x296   :  { %v4315_v23 = vpop.eup %4314  ;;  %v387_v25 = vmul.f32 1.442695, %v373_v22  ;;  %v4046_v22 = vld [vmem:[%s5627_s28 + $0x8] sm:$0xff] }
 0x297   :  { %v403_v26 = vsel %vm136_vm1, %v4315_v23, 0.0  ;;  %v4226_v27 = vpop.permute.xlu0 %4225  ;;  %v4317_v31 = vpop.eup %4316 }
 0x298   :  { %4318 = vpow2.f32 %v387_v25  ;;  %404 = vadd.xlane.f32.xlu1 %v403_v26  ;;  %v4228_v28 = vunpack.i.h.bf16 %v4226_v27  ;;  %v4227_v29 = vunpack.i.l.bf16 %v4226_v27  ;;  %v400_v33 = vsel %vm136_vm1, %v4317_v31, 0.0 }
 0x299   :  { %4320 = vpow2.f32 %v385_v30 }
 0x29a   :  { %452 = vmatpush.msra.mxu3 %v4227_v29  ;;  %530 = vmatpush.msra.mxu2 %v4228_v28 }
 0x29e   :  { %v4659_v32 = vpop.eup %4318 }
 0x29f   :  { %v409_v34 = vsel %vm136_vm1, %v4659_v32, 0.0  ;;  %v4321_v36 = vpop.eup %4320 }
 0x2a0   :  { %401 = vadd.xlane.f32.xlu1 %v400_v33  ;;  %410 = vadd.xlane.f32.xlu2 %v409_v34  ;;  %v406_v37 = vsel %vm136_vm1, %v4321_v36, 0.0  ;;  %v396_v14 = vpop.xlane.xlu2 %395 }
 0x2a4   :  { %4240 = vrot.lane.b32.xlu0 %v4239_v35, %s4414_s1 }
 0x2a8   :  { %407 = vadd.xlane.f32.xlu1 %v406_v37 }
 0x2b8   :  { %4235 = vrot.lane.b32.xlu2 %v4234_v38, %s4414_s1 }
 0x2c1   :  { %4230 = vrot.lane.b32.xlu1 %v4229_v39, %s4414_s1  ;;  %s5628_s1 = sld [smem:[#allocation11_spill]] }
 0x2c2   :  { %v393_v40 = vpop.xlane.xlu0 %392 }
 0x2c3   :  { %4322 = vrcp.f32 %v393_v40 }
 0x2c7   :  { %v4295_v40 = vld [vmem:[%s5628_s1] ss:$0 sm:$0xff] }
 0x2c9   :  { %v4323_v41 = vpop.eup %4322 }
 0x2ca   :  { %v423_v11 = vmul.f32 %v4323_v41, %v4309_v58 }
 0x2cc   :  { %3319 = vmatmul.msk.f32.vlgmr.msra.gmra.mxu3 %vm136_vm1, %v423_v11 }
 0x303   :  { %v399_v51 = vpop.xlane.xlu0 %398 }
 0x304   :  { %v414_v42 = vpop.xlane.xlu2 %413 }
 0x30b   :  { %v405_v43 = vpop.xlane.xlu1 %404 }
 0x30c   :  { %4324 = vrcp.f32 %v405_v43 }
 0x312   :  { %v4325_v10 = vpop.eup %4324 }
 0x313   :  { %v402_v44 = vpop.xlane.xlu1 %401  ;;  %v411_v45 = vpop.xlane.xlu2 %410  ;;  %v427_v48 = vmul.f32 %v4325_v10, %v4315_v23  ;;  %v4045_v23 = vld [vmem:[%s5627_s28] sm:$0xff] }
 0x314   :  { %4326 = vrcp.f32 %v402_v44 }
 0x315   :  { %4328 = vrcp.f32 %v414_v42 }
 0x316   :  { %4330 = vrcp.f32 %v396_v14  ;;  %v4241_v56 = vpop.permute.xlu0 %4240 }
 0x317   :  { %4332 = vrcp.f32 %v399_v51  ;;  %v4243_v62 = vunpack.i.h.bf16 %v4241_v56  ;;  %v4242_v63 = vunpack.i.l.bf16 %v4241_v56 }
 0x318   :  { %4334 = vrcp.f32 %v411_v45 }
 0x31a   :  { %v4327_v15 = vpop.eup %4326 }
 0x31b   :  { %v426_v46 = vmul.f32 %v4327_v15, %v4317_v31  ;;  %v4236_v9 = vpop.permute.xlu2 %4235  ;;  %v4329_v49 = vpop.eup %4328  ;;  %v4418_v15 = vmov 32.0  }
 0x31c   :  { %v4238_v13 = vunpack.i.h.bf16 %v4236_v9  ;;  %v4237_v47 = vunpack.i.l.bf16 %v4236_v9  ;;  %v430_v50 = vmul.f32 %v4329_v49, %v4652_v16  ;;  %v408_v52 = vpop.xlane.xlu1 %407  ;;  %v4331_v54 = vpop.eup %4330 }
 0x31d   :  { %3322 = vmatmul.msk.f32.vlgmr.msra.gmra.mxu2 %vm136_vm1, %v426_v46  ;;  %v4333_v55 = vpop.eup %4332  ;;  %4336 = vrcp.f32 %v408_v52  ;;  %v424_v61 = vmul.f32 %v4331_v54, %v4645_v53 }
 0x31e   :  { %556 = vmatpush.msrb.mxu3 %v4237_v47  ;;  %634 = vmatpush.msrb.mxu2 %v4238_v13  ;;  %v425_v60 = vmul.f32 %v4333_v55, %v4650_v7  ;;  %v4335_v0 = vpop.eup %4334  ;;  %4338 = vrcp.f32 %v4418_v15  ;;  %v4050_v13 = vld [vmem:[%s5597_s11 + $0x8] sm:$0xff] }
 0x31f   :  { %3323 = vmatmul.msk.f32.vlgmr.msrb.gmra.mxu3 %vm136_vm1, %v427_v48  ;;  %v429_v4 = vmul.f32 %v4335_v0, %v4659_v32  ;;  %v79_v48 = vld [vmem:[%s5629_s5 + $0x8] sm:$0xff] }
 0x320   :  { %701 = vmatpush.bf16.msra.mxu3 %v4046_v22  ;;  %v4048_v0 = vld [vmem:[%s5595_s9 + $0x8] sm:$0xff] }
 0x323   :  { %v4337_v1 = vpop.eup %4336 }
 0x324   :  { %v428_v5 = vmul.f32 %v4337_v1, %v4321_v36  ;;  %702 = vmatpush.bf16.msra.mxu3 %v4045_v23  ;;  %v4339_v46 = vpop.eup %4338 }
 0x325   :  { %3326 = vmatmul.msk.f32.vlgmr.msrb.gmra.mxu2 %vm136_vm1, %v430_v50  ;;  %v720_v9 = vmul.f32 32.0, %v4339_v46  ;;  %vm724_vm4 = vweird.f32 %v4339_v46 }
 0x327   :  { %v721_v47 = vsub.f32 1.0, %v720_v9 }
 0x329   :  { %v722_v50 = vmul.f32 %v4339_v46, %v721_v47 }
 0x32b   :  { %v723_v51 = vadd.f32 %v4339_v46, %v722_v50 }
 0x32d   :  { %v4722_v52 = vsel %vm724_vm4, %v4339_v46, %v723_v51 }
 0x333   :  { %v4231_v57 = vpop.permute.xlu1 %4230 }
 0x334   :  { %v4233_v58 = vunpack.i.h.bf16 %v4231_v57  ;;  %v4232_v59 = vunpack.i.l.bf16 %v4231_v57 }
 0x336   :  { %478 = vmatpush.msrb.mxu0 %v4232_v59  ;;  %504 = vmatpush.msra.mxu1 %v4233_v58 }
 0x337   :  { %3320 = vmatmul.msk.f32.vlgmr.msrb.gmra.mxu0 %vm136_vm1, %v424_v61  ;;  %3321 = vmatmul.msk.f32.vlgmr.msra.gmra.mxu1 %vm136_vm1, %v425_v60 }
 0x338   :  { %582 = vmatpush.msra.mxu0 %v4242_v63  ;;  %608 = vmatpush.msrb.mxu1 %v4243_v62 }
 0x33a   :  { %842 = vmatpush.bf16.msra.mxu1 %v4050_v13  ;;  %804 = vmatpush.bf16.msrb.mxu0 %v4048_v0 }
 0x33f   :  { %3324 = vmatmul.msk.f32.vlgmr.msra.gmra.mxu0 %vm136_vm1, %v428_v5  ;;  %3325 = vmatmul.msk.f32.vlgmr.msrb.gmra.mxu1 %vm136_vm1, %v429_v4 }
 0x34f   :  { %v454_v6 = vpop.f32.mrf.mxu3 }
 0x3a0   :  { %v532_v53 = vpop.f32.mrf.mxu2 }
 0x3a2   :  { %v558_v16 = vpop.f32.mrf.mxu3 }
 0x3a8   :  { %v636_v17 = vpop.f32.mrf.mxu2 }
 0x3b4   :  { %v480_v7 = vpop.f32.mrf.mxu0  ;;  %v506_v8 = vpop.f32.mrf.mxu1 }
 0x3b5   :  { %v4244_v12 = vpack.i.bf16 %v532_v53, %v506_v8  ;;  %v4047_v53 = vld [vmem:[%s5595_s9] sm:$0xff] }
 0x3b6   :  { %805 = vmatpush.bf16.msrb.mxu0 %v4047_v53 }
 0x3b7   :  { %4245 = vrot.lane.b32.xlu0 %v4244_v12, %s4415_s26 }
 0x3bc   :  { %v584_v18 = vpop.f32.mrf.mxu0  ;;  %v610_v19 = vpop.f32.mrf.mxu1 }
 0x3bd   :  { %v4249_v20 = vpack.i.bf16 %v584_v18, %v558_v16  ;;  %v4254_v21 = vpack.i.bf16 %v636_v17, %v610_v19 }
 0x3bf   :  { %4255 = vrot.lane.b32.xlu0 %v4254_v21, %s4416_s2  ;;  %4250 = vrot.lane.b32.xlu1 %v4249_v20, %s5614_s6 }
 0x429   :  { %v4246_v24 = vpop.permute.xlu0 %4245 }
 0x42a   :  { %v4248_v25 = vunpack.i.h.bf16 %v4246_v24  ;;  %v4247_v26 = vunpack.i.l.bf16 %v4246_v24 }
 0x42c   :  { %v664_v33 = vsel %vm136_vm1, %v480_v7, %v4248_v25  ;;  %v663_v34 = vsel %vm136_vm1, %v454_v6, %v4247_v26  ;;  %v4298_v6 = vld [vmem:[%s5598_s12] ss:$0 sm:$0xff] }
 0x431   :  { %v4256_v27 = vpop.permute.xlu0 %4255  ;;  %v4251_v28 = vpop.permute.xlu1 %4250 }
 0x432   :  { %v4258_v29 = vunpack.i.h.bf16 %v4256_v27  ;;  %v4257_v30 = vunpack.i.l.bf16 %v4256_v27  ;;  %v4253_v31 = vunpack.i.h.bf16 %v4251_v28  ;;  %v4252_v32 = vunpack.i.l.bf16 %v4251_v28 }
 0x434   :  { %v667_v35 = vsel %vm665_vm2, %v664_v33, %v4253_v31  ;;  %v666_v36 = vsel %vm665_vm2, %v663_v34, %v4252_v32  ;;  %v4296_v32 = vld [vmem:[%s5630_s24] ss:$0 sm:$0xff] }
 0x435   :  { %v670_v37 = vsel %vm668_vm3, %v667_v35, %v4258_v29  ;;  %v669_v38 = vsel %vm668_vm3, %v666_v36, %v4257_v30  ;;  %v4297_v36 = vld [vmem:[%s5594_s8] ss:$0 sm:$0xff]  ;;  %s5631_s8 = smov 16  }
 0x436   :  { %v671_v39 = vpack.c.bf16 %v670_v37, %v669_v38 }
 0x438   :  { %3335 = vmatmul.msk.bf16.vlgmr.msra.gmra.mxu3 %vm102_vm0, %v671_v39 }
 0x4bb   :  { %v704_v41 = vpop.f32.mrf.mxu3 }
 0x4bc   :  { %v705_v11 = vadd.f32 %v4295_v40, %v704_v41 }
 0x4be   :  { %v709_v14 = vadd.f32 %v705_v11, %v4550_v2  ;;  %v4049_v2 = vld [vmem:[%s5597_s11] sm:$0xff] }
 0x4bf   :  { %843 = vmatpush.bf16.msra.mxu1 %v4049_v2 }
 0x4c0   :  { %v713_v42 = vsel %vm102_vm0, %v709_v14, 0.0 }
 0x4c1   :  { %714 = vadd.xlane.f32.xlu2 %v713_v42  ;;  %v4299_v42 = vld [vmem:[%s5596_s10] ss:$0 sm:$0xff] }
 0x4c3   :  { %v706_v43 = vpop.f32.mrf.mxu3 }
 0x4c4   :  { %v707_v44 = vadd.f32 %v4295_v40, %v706_v43 }
 0x4c6   :  { %v710_v45 = vadd.f32 %v707_v44, %v4555_v3  ;;  %v78_v3 = vld [vmem:[%s5629_s5] sm:$0xff] }
 0x4c7   :  { %v812_v49 = vpack.c.bf16 %v79_v48, %v78_v3 }
 0x4c8   :  { %v716_v10 = vsel %vm102_vm0, %v710_v45, 0.0 }
 0x4c9   :  { %717 = vadd.xlane.f32.xlu1 %v716_v10  ;;  %3353 = vmatmul.msk.bf16.vlgmr.msra.gmra.mxu1 %vm102_vm0, %v812_v49 }
 0x534   :  { %v715_v54 = vpop.xlane.xlu2 %714 }
 0x535   :  { %v726_v55 = vmul.f32 %v4722_v52, %v715_v54 }
 0x537   :  { %v728_v56 = vsub.f32 %v709_v14, %v726_v55 }
 0x539   :  { %v730_v57 = vmul.f32 %v728_v56, %v728_v56 }
 0x53b   :  { %v732_v58 = vsel %vm102_vm0, %v730_v57, 0.0 }
 0x53c   :  { %v718_v59 = vpop.xlane.xlu1 %717  ;;  %733 = vadd.xlane.f32.xlu0 %v732_v58 }
 0x53d   :  { %v727_v60 = vmul.f32 %v4722_v52, %v718_v59 }
 0x53f   :  { %v729_v61 = vsub.f32 %v710_v45, %v727_v60 }
 0x541   :  { %v731_v62 = vmul.f32 %v729_v61, %v729_v61 }
 0x543   :  { %v735_v63 = vsel %vm102_vm0, %v731_v62, 0.0 }
 0x544   :  { %736 = vadd.xlane.f32.xlu2 %v735_v63 }
 0x546   :  { %v845_v7 = vpop.f32.mrf.mxu1 }
 0x547   :  { %v4739_v16 = vadd.f32 %v4298_v6, %v845_v7 }
 0x549   :  { %866 = vrot.lane.b32.xlu1 %v4739_v16, %s4411_s0  ;;  %3354 = vmatpush.xpose.msk.msra.mxu2 %vm136_vm1, %v4739_v16 }
 0x54e   :  { %v847_v21 = vpop.f32.mrf.mxu1 }
 0x54f   :  { %v4745_v23 = vadd.f32 %v4298_v6, %v847_v21 }
 0x551   :  { %3356 = vmatpush.xpose.msk.msrb.mxu2 %vm136_vm1, %v4745_v23 }
 0x55c   :  { %872 = vrot.lane.b32.xlu2 %v4745_v23, %s4410_s3 }
 0x5af   :  { %v734_v1 = vpop.xlane.xlu0 %733 }
 0x5b0   :  { %v738_v4 = vmul.f32 %v734_v1, %v4722_v52 }
 0x5b2   :  { %v740_v5 = vadd.f32 1e-05, %v738_v4 }
 0x5b4   :  { %4340 = vrsqrt.f32 %v740_v5  ;;  %vm748_vm6 = vweird.f32 %v740_v5 }
 0x5b7   :  { %v737_v8 = vpop.xlane.xlu2 %736 }
 0x5b8   :  { %v739_v12 = vmul.f32 %v737_v8, %v4722_v52 }
 0x5ba   :  { %v4341_v17 = vpop.eup %4340  ;;  %v741_v18 = vadd.f32 1e-05, %v739_v12 }
 0x5bb   :  { %v743_v19 = vmul.f32 %v4341_v17, %v740_v5  ;;  %vm749_vm5 = vweird.f32 %v4341_v17  ;;  %v4764_v14 = vpop.permute.xlu1 %866 }
 0x5bc   :  { %4342 = vrsqrt.f32 %v741_v18  ;;  %vm750_vm7 = vmor %vm748_vm6, %vm749_vm5  ;;  %vm758_vm9 = vweird.f32 %v741_v18  ;;  %3358 = vmatpush.xpose.msk.msrb.mxu3 %vm136_vm1, %v4764_v14 }
 0x5bd   :  { %v744_v20 = vmul.f32 %v4341_v17, %v743_v19  ;;  %v4259_v19 = vpack.i.bf16 %v4764_v14, %v4745_v23 }
 0x5bf   :  { %v745_v22 = vmul.f32 0.5, %v744_v20  ;;  %v4774_v45 = vpop.permute.xlu2 %872 }
 0x5c1   :  { %v746_v24 = vsub.f32 1.5, %v745_v22 }
 0x5c2   :  { %v4343_v25 = vpop.eup %4342 }
 0x5c3   :  { %v747_v26 = vmul.f32 %v4341_v17, %v746_v24  ;;  %v753_v27 = vmul.f32 %v4343_v25, %v741_v18  ;;  %vm759_vm8 = vweird.f32 %v4343_v25 }
 0x5c4   :  { %vm760_vm10 = vmor %vm758_vm9, %vm759_vm8 }
 0x5c5   :  { %v754_v28 = vmul.f32 %v4343_v25, %v753_v27  ;;  %v751_v29 = vsel %vm750_vm7, %v4341_v17, %v747_v26 }
 0x5c6   :  { %v762_v33 = vmul.f32 %v751_v29, %v728_v56 }
 0x5c7   :  { %v755_v30 = vmul.f32 0.5, %v754_v28 }
 0x5c8   :  { %v767_v37 = vmul.f32 %v4296_v32, %v762_v33 }
 0x5c9   :  { %v756_v31 = vsub.f32 1.5, %v755_v30 }
 0x5ca   :  { %v4757_v40 = vadd.f32 %v4297_v36, %v767_v37 }
 0x5cb   :  { %v757_v34 = vmul.f32 %v4343_v25, %v756_v31 }
 0x5cd   :  { %v761_v35 = vsel %vm760_vm10, %v4343_v25, %v757_v34 }
 0x5ce   :  { %v763_v38 = vmul.f32 %v761_v35, %v729_v61 }
 0x5d0   :  { %v768_v39 = vmul.f32 %v4296_v32, %v763_v38 }
 0x5d2   :  { %v4759_v41 = vadd.f32 %v4297_v36, %v768_v39 }
 0x5d4   :  { %v774_v11 = vpack.c.bf16 %v4759_v41, %v4757_v40 }
 0x5d6   :  { %3344 = vmatmul.msk.bf16.vlgmr.msrb.gmra.mxu0 %vm102_vm0, %v774_v11 }
 0x653   :  { %v807_v43 = vpop.f32.mrf.mxu0 }
 0x654   :  { %v808_v44 = vadd.f32 %v4299_v42, %v807_v43 }
 0x656   :  { %860 = vrot.lane.b32.xlu2 %v808_v44, %s4412_s4  ;;  %852 = vrot.lane.b32.xlu0 %v808_v44, %s4411_s0 }
 0x657   :  { %3355 = vmatmul.msk.f32.vlgmr.msra.gmra.mxu2 %vm136_vm1, %v808_v44 }
 0x658   :  { %3364 = vmatpush.xpose.msk.msra.mxu2 %vm136_vm1, %v4774_v45 }
 0x65b   :  { %v809_v10 = vpop.f32.mrf.mxu0 }
 0x65c   :  { %v810_v15 = vadd.f32 %v4299_v42, %v809_v10 }
 0x65e   :  { %858 = vrot.lane.b32.xlu1 %v810_v15, %s4410_s3  ;;  %870 = vrot.lane.b32.xlu2 %v4739_v16, %s4410_s3 }
 0x65f   :  { %874 = vrot.lane.b32.xlu0 %v4739_v16, %s4412_s4  ;;  %3357 = vmatmul.msk.f32.vlgmr.msrb.gmra.mxu2 %vm136_vm1, %v810_v15 }
 0x666   :  { %854 = vrot.lane.b32.xlu1 %v810_v15, %s4411_s0  ;;  %862 = vrot.lane.b32.xlu2 %v810_v15, %s4412_s4 }
 0x667   :  { %868 = vrot.lane.b32.xlu0 %v4745_v23, %s4411_s0 }
 0x66e   :  { %856 = vrot.lane.b32.xlu1 %v808_v44, %s4410_s3 }
 0x66f   :  { %876 = vrot.lane.b32.xlu0 %v4745_v23, %s4412_s4 }
 0x6b0   :  { %v861_v46 = vpop.permute.xlu2 %860 }
 0x6b8   :  { %v4791_v9 = vpop.permute.xlu2 %870 }
 0x6b9   :  { %3362 = vmatpush.xpose.msk.msrb.mxu1 %vm136_vm1, %v4791_v9 }
 0x6c0   :  { %v863_v57 = vpop.permute.xlu2 %862 }
 0x6c8   :  { %v853_v13 = vpop.permute.xlu0 %852 }
 0x6c9   :  { %3359 = vmatmul.msk.f32.vlgmr.msrb.gmra.mxu3 %vm136_vm1, %v853_v13 }
 0x6d0   :  { %v859_v47 = vpop.permute.xlu1 %858 }
 0x6d1   :  { %v4796_v2 = vpop.permute.xlu0 %874  ;;  %3365 = vmatmul.msk.f32.vlgmr.msra.gmra.mxu2 %vm136_vm1, %v859_v47 }
 0x6d2   :  { %3366 = vmatpush.xpose.msk.msra.mxu3 %vm136_vm1, %v4796_v2 }
 0x6d5   :  { %3367 = vmatmul.msk.f32.vlgmr.msra.gmra.mxu3 %vm136_vm1, %v861_v46 }
 0x6d8   :  { %v855_v3 = vpop.permute.xlu1 %854 }
 0x6d9   :  { %v4802_v48 = vpop.permute.xlu0 %868 }
 0x6da   :  { %v899_v49 = vpop.f32.mrf.mxu2  ;;  %3360 = vmatpush.xpose.msk.msra.mxu0 %vm136_vm1, %v4802_v48 }
 0x6db   :  { %v1070_v50 = vsel %vm136_vm1, %v899_v49, -inf }
 0x6dc   :  { %1071 = vmax.xlane.f32.xlu2 %v1070_v50 }
 0x6dd   :  { %3361 = vmatmul.msk.f32.vlgmr.msra.gmra.mxu0 %vm136_vm1, %v855_v3 }
 0x6e0   :  { %v857_v51 = vpop.permute.xlu1 %856 }
 0x6e1   :  { %v4808_v54 = vpop.permute.xlu0 %876  ;;  %3363 = vmatmul.msk.f32.vlgmr.msrb.gmra.mxu1 %vm136_vm1, %v857_v51 }
 0x6e2   :  { %v923_v55 = vpop.f32.mrf.mxu2  ;;  %3368 = vmatpush.xpose.msk.msrb.mxu0 %vm136_vm1, %v4808_v54 }
 0x6e3   :  { %v1073_v56 = vsel %vm136_vm1, %v923_v55, -inf }
 0x6e4   :  { %1074 = vmax.xlane.f32.xlu0 %v1073_v56 }
 0x6e5   :  { %3369 = vmatmul.msk.f32.vlgmr.msrb.gmra.mxu0 %vm136_vm1, %v863_v57 }
 0x74c   :  { %v947_v58 = vpop.f32.mrf.mxu3 }
 0x74d   :  { %v1076_v59 = vsel %vm136_vm1, %v947_v58, -inf }
 0x74e   :  { %1077 = vmax.xlane.f32.xlu1 %v1076_v59  ;;  %v4269_v59 = vpack.i.bf16 %v4796_v2, %v4774_v45 }
 0x74f   :  { %v1072_v62 = vpop.xlane.xlu2 %1071 }
 0x750   :  { %v1094_v1 = vsub.f32 %v899_v49, %v1072_v62 }
 0x752   :  { %v1102_v5 = vmul.f32 1.442695, %v1094_v1 }
 0x754   :  { %v4816_v60 = vpop.f32.mrf.mxu2  ;;  %4344 = vpow2.f32 %v1102_v5 }
 0x755   :  { %v1085_v61 = vsel %vm136_vm1, %v4816_v60, -inf }
 0x756   :  { %1086 = vmax.xlane.f32.xlu1 %v1085_v61  ;;  %v4264_v61 = vpack.i.bf16 %v4802_v48, %v4739_v16 }
 0x757   :  { %v1075_v20 = vpop.xlane.xlu0 %1074 }
 0x758   :  { %v1043_v63 = vpop.f32.mrf.mxu3  ;;  %v1095_v21 = vsub.f32 %v923_v55, %v1075_v20 }
 0x759   :  { %v1088_v0 = vsel %vm136_vm1, %v1043_v63, -inf }
 0x75a   :  { %v971_v4 = vpop.f32.mrf.mxu0  ;;  %1089 = vmax.xlane.f32.xlu2 %v1088_v0  ;;  %v4824_v17 = vpop.eup %4344  ;;  %v1104_v22 = vmul.f32 1.442695, %v1095_v21 }
 0x75b   :  { %v1079_v12 = vsel %vm136_vm1, %v971_v4, -inf  ;;  %v1118_v18 = vsel %vm136_vm1, %v4824_v17, 0.0 }
 0x75c   :  { %4346 = vpow2.f32 %v1104_v22 }
 0x75e   :  { %v995_v53 = vpop.f32.mrf.mxu1 }
 0x75f   :  { %v1082_v6 = vsel %vm136_vm1, %v995_v53, -inf }
 0x760   :  { %1083 = vmax.xlane.f32.xlu0 %v1082_v6 }
 0x762   :  { %v1067_v7 = vpop.f32.mrf.mxu0  ;;  %v4347_v24 = vpop.eup %4346 }
 0x763   :  { %v1091_v8 = vsel %vm136_vm1, %v1067_v7, -inf  ;;  %v1121_v25 = vsel %vm136_vm1, %v4347_v24, 0.0 }
 0x764   :  { %1092 = vmax.xlane.f32.xlu1 %v1091_v8 }
 0x768   :  { %1080 = vmax.xlane.f32.xlu0 %v1079_v12 }
 0x76c   :  { %1119 = vadd.xlane.f32.xlu1 %v1118_v18 }
 0x772   :  { %4260 = vrot.lane.b32.xlu2 %v4259_v19, %s4413_s30 }
 0x79b   :  { %1122 = vadd.xlane.f32.xlu2 %v1121_v25 }
 0x7c1   :  { %v1078_v26 = vpop.xlane.xlu1 %1077 }
 0x7c2   :  { %v1096_v23 = vsub.f32 %v947_v58, %v1078_v26 }
 0x7c4   :  { %v1106_v14 = vmul.f32 1.442695, %v1096_v23 }
 0x7c9   :  { %v1087_v29 = vpop.xlane.xlu1 %1086 }
 0x7ca   :  { %v1099_v15 = vsub.f32 %v4816_v60, %v1087_v29  ;;  %v4274_v60 = vpack.i.bf16 %v4808_v54, %v4791_v9 }
 0x7cc   :  { %v1112_v3 = vmul.f32 1.442695, %v1099_v15 }
 0x7cd   :  { %v1090_v27 = vpop.xlane.xlu2 %1089 }
 0x7ce   :  { %v1100_v28 = vsub.f32 %v1043_v63, %v1090_v27 }
 0x7d0   :  { %v1114_v30 = vmul.f32 1.442695, %v1100_v28 }
 0x7d2   :  { %4348 = vpow2.f32 %v1114_v30 }
 0x7d3   :  { %v1084_v31 = vpop.xlane.xlu0 %1083 }
 0x7d4   :  { %v1098_v32 = vsub.f32 %v995_v53, %v1084_v31 }
 0x7d5   :  { %v4261_v33 = vpop.permute.xlu2 %4260 }
 0x7d6   :  { %v1110_v34 = vmul.f32 1.442695, %v1098_v32  ;;  %v4263_v35 = vunpack.i.h.bf16 %v4261_v33  ;;  %v4262_v36 = vunpack.i.l.bf16 %v4261_v33 }
 0x7d7   :  { %v1093_v37 = vpop.xlane.xlu1 %1092 }
 0x7d8   :  { %v4832_v38 = vpop.eup %4348  ;;  %4350 = vpow2.f32 %v1110_v34  ;;  %v1101_v39 = vsub.f32 %v1067_v7, %v1093_v37  ;;  %1205 = vmatpush.msrb.mxu2 %v4262_v36  ;;  %1231 = vmatpush.msrb.mxu3 %v4263_v35 }
 0x7d9   :  { %v1136_v11 = vsel %vm136_vm1, %v4832_v38, 0.0 }
 0x7da   :  { %v1116_v42 = vmul.f32 1.442695, %v1101_v39  ;;  %1137 = vadd.xlane.f32.xlu1 %v1136_v11 }
 0x7db   :  { %v1081_v43 = vpop.xlane.xlu0 %1080 }
 0x7dc   :  { %4352 = vpow2.f32 %v1116_v42  ;;  %v1097_v44 = vsub.f32 %v971_v4, %v1081_v43 }
 0x7dd   :  { %4354 = vpow2.f32 %v1106_v14 }
 0x7de   :  { %v4836_v10 = vpop.eup %4350  ;;  %v1108_v46 = vmul.f32 1.442695, %v1097_v44  ;;  %v4052_v44 = vld [vmem:[%s5599_s13 + $0x8] sm:$0xff] }
 0x7df   :  { %v1130_v13 = vsel %vm136_vm1, %v4836_v10, 0.0  ;;  %v1120_v45 = vpop.xlane.xlu1 %1119 }
 0x7e0   :  { %4356 = vpow2.f32 %v1108_v46  ;;  %1131 = vadd.xlane.f32.xlu0 %v1130_v13 }
 0x7e1   :  { %4358 = vpow2.f32 %v1112_v3 }
 0x7e2   :  { %v4841_v47 = vpop.eup %4352 }
 0x7e3   :  { %v1139_v49 = vsel %vm136_vm1, %v4841_v47, 0.0  ;;  %v4355_v50 = vpop.eup %4354 }
 0x7e4   :  { %1140 = vadd.xlane.f32.xlu1 %v1139_v49  ;;  %v1124_v55 = vsel %vm136_vm1, %v4355_v50, 0.0 }
 0x7e6   :  { %v4357_v51 = vpop.eup %4356 }
 0x7e7   :  { %v1127_v56 = vsel %vm136_vm1, %v4357_v51, 0.0  ;;  %v4359_v57 = vpop.eup %4358 }
 0x7e8   :  { %1125 = vadd.xlane.f32.xlu0 %v1124_v55  ;;  %1128 = vadd.xlane.f32.xlu2 %v1127_v56  ;;  %v1133_v58 = vsel %vm136_vm1, %v4359_v57, 0.0 }
 0x7f0   :  { %1134 = vadd.xlane.f32.xlu0 %v1133_v58 }
 0x7fd   :  { %4270 = vrot.lane.b32.xlu1 %v4269_v59, %s4413_s30 }
 0x800   :  { %4275 = vrot.lane.b32.xlu2 %v4274_v60, %s4413_s30 }
 0x804   :  { %4265 = vrot.lane.b32.xlu0 %v4264_v61, %s4413_s30  ;;  %s3282_s30 = sshll.u32 %s5609_s23, 4  ;;  %s3283_s30 = int_to_ptr.hbm [resolvable:$true] %s3282_s30 }
 0x80e   :  { %v1123_v62 = vpop.xlane.xlu2 %1122 }
 0x80f   :  { %4360 = vrcp.f32 %v1123_v62 }
 0x815   :  { %v4361_v63 = vpop.eup %4360 }
 0x816   :  { %v1151_v0 = vmul.f32 %v4361_v63, %v4347_v24  ;;  %v4300_v63 = vld [vmem:[%s5600_s14] ss:$0 sm:$0xff] }
 0x818   :  { %3371 = vmatmul.msk.f32.vlgmr.msrb.gmra.mxu2 %vm136_vm1, %v1151_v0 }
 0x84d   :  { %v1138_v4 = vpop.xlane.xlu1 %1137 }
 0x853   :  { %v1132_v1 = vpop.xlane.xlu0 %1131 }
 0x857   :  { %v1141_v16 = vpop.xlane.xlu1 %1140 }
 0x85b   :  { %v1126_v2 = vpop.xlane.xlu0 %1125  ;;  %v1129_v48 = vpop.xlane.xlu2 %1128 }
 0x85c   :  { %4362 = vrcp.f32 %v1126_v2 }
 0x85d   :  { %4364 = vrcp.f32 %v1138_v4 }
 0x862   :  { %v4363_v5 = vpop.eup %4362 }
 0x863   :  { %v1152_v9 = vmul.f32 %v4363_v5, %v4355_v50  ;;  %v1135_v54 = vpop.xlane.xlu0 %1134  ;;  %v4365_v53 = vpop.eup %4364 }
 0x864   :  { %4366 = vrcp.f32 %v1135_v54  ;;  %v1156_v18 = vmul.f32 %v4365_v53, %v4832_v38  ;;  %v4276_v22 = vpop.permute.xlu2 %4275 }
 0x865   :  { %3372 = vmatmul.msk.f32.vlgmr.msrb.gmra.mxu3 %vm136_vm1, %v1152_v9  ;;  %4368 = vrcp.f32 %v1120_v45  ;;  %v4278_v29 = vunpack.i.h.bf16 %v4276_v22  ;;  %v4277_v30 = vunpack.i.l.bf16 %v4276_v22 }
 0x866   :  { %4370 = vrcp.f32 %v1129_v48 }
 0x867   :  { %4372 = vrcp.f32 %v1132_v1 }
 0x868   :  { %4374 = vrcp.f32 %v1141_v16 }
 0x86a   :  { %v4367_v6 = vpop.eup %4366 }
 0x86b   :  { %v1155_v19 = vmul.f32 %v4367_v6, %v4359_v57  ;;  %v4369_v20 = vpop.eup %4368 }
 0x86c   :  { %v4371_v21 = vpop.eup %4370  ;;  %v1150_v27 = vmul.f32 %v4369_v20, %v4824_v17  ;;  %v4077_v20 = vld [vmem:[%s5603_s17 + $0xbc] sm:$0xf0] }
 0x86d   :  { %v1153_v28 = vmul.f32 %v4371_v21, %v4357_v51  ;;  %v4373_v31 = vpop.eup %4372  ;;  %v4069_v21 = vld [vmem:[%s5603_s17 + $0x84] sm:$0xf] }
 0x86e   :  { %v4375_v32 = vpop.eup %4374  ;;  %v1154_v33 = vmul.f32 %v4373_v31, %v4836_v10  ;;  %v4051_v10 = vld [vmem:[%s5599_s13] sm:$0xff]  ;;  %v4070_v31 = vld [vmem:[%s5603_s17 + $0x8c] sm:$0xf] }
 0x86f   :  { %v4271_v7 = vpop.permute.xlu1 %4270  ;;  %v1157_v23 = vmul.f32 %v4375_v32, %v4841_v47  ;;  %v3463_v32 = vld [vmem:[%s5603_s17 + $0xc8] sm:$0xf0] }
 0x870   :  { %v4273_v8 = vunpack.i.h.bf16 %v4271_v7  ;;  %v4272_v12 = vunpack.i.l.bf16 %v4271_v7 }
 0x872   :  { %1309 = vmatpush.msra.mxu2 %v4272_v12  ;;  %1335 = vmatpush.msra.mxu3 %v4273_v8 }
 0x873   :  { %3375 = vmatmul.msk.f32.vlgmr.msra.gmra.mxu2 %vm136_vm1, %v1155_v19  ;;  %3376 = vmatmul.msk.f32.vlgmr.msra.gmra.mxu3 %vm136_vm1, %v1156_v18  ;;  %v3453_v19 = vld [vmem:[%s5603_s17 + $0x80] sm:$0xf] }
 0x876   :  { %v4266_v24 = vpop.permute.xlu0 %4265 }
 0x877   :  { %v4268_v25 = vunpack.i.h.bf16 %v4266_v24  ;;  %v4267_v26 = vunpack.i.l.bf16 %v4266_v24  ;;  %v3454_v24 = vor.u32 %v4077_v20, %v3453_v19 }
 0x879   :  { %1179 = vmatpush.msra.mxu1 %v4267_v26  ;;  %1257 = vmatpush.msra.mxu0 %v4268_v25  ;;  %v3455_v25 = vld [vmem:[%s5603_s17 + $0xc0] sm:$0xf0]  ;;  %v3461_v26 = vld [vmem:[%s5603_s17 + $0x88] sm:$0xf] }
 0x87a   :  { %3370 = vmatmul.msk.f32.vlgmr.msra.gmra.mxu1 %vm136_vm1, %v1150_v27  ;;  %3373 = vmatmul.msk.f32.vlgmr.msra.gmra.mxu0 %vm136_vm1, %v1153_v28  ;;  %v4078_v27 = vld [vmem:[%s5603_s17 + $0xc4] sm:$0xf0] }
 0x87b   :  { %1283 = vmatpush.msrb.mxu1 %v4277_v30  ;;  %1361 = vmatpush.msrb.mxu0 %v4278_v29  ;;  %v3458_v29 = vor.u32 %v4069_v21, %v3455_v25  ;;  %v3462_v30 = vor.u32 %v4078_v27, %v3461_v26  ;;  %v4301_v25 = vld [vmem:[%s5601_s15] ss:$0 sm:$0xff] }
 0x87c   :  { %1730 = vmatpush.bf16.msrb.mxu2 %v3454_v24 }
 0x87d   :  { %1426 = vmatpush.bf16.msra.mxu1 %v4052_v44  ;;  %1744 = vmatpush.bf16.msrb.mxu3 %v3458_v29  ;;  %v4302_v29 = vld [vmem:[%s5602_s16] ss:$0 sm:$0xff] }
 0x87e   :  { %1758 = vmatpush.bf16.msra.mxu0 %v3462_v30 }
 0x881   :  { %1427 = vmatpush.bf16.msra.mxu1 %v4051_v10 }
 0x882   :  { %3374 = vmatmul.msk.f32.vlgmr.msrb.gmra.mxu1 %vm136_vm1, %v1154_v33  ;;  %3377 = vmatmul.msk.f32.vlgmr.msrb.gmra.mxu0 %vm136_vm1, %v1157_v23  ;;  %v3466_v33 = vor.u32 %v4070_v31, %v3463_v32 }
 0x885   :  { %1772 = vmatpush.bf16.msrb.mxu1 %v3466_v33  ;;  %v3485_v33 = vld [vmem:[%s5603_s17 + $0xa0] sm:$0xf] }
 0x89b   :  { %v1207_v17 = vpop.f32.mrf.mxu2 }
 0x8e8   :  { %v1233_v34 = vpop.f32.mrf.mxu3 }
 0x8f6   :  { %v1311_v38 = vpop.f32.mrf.mxu2  ;;  %v1337_v39 = vpop.f32.mrf.mxu3 }
 0x8f7   :  { %v1181_v35 = vpop.f32.mrf.mxu1  ;;  %v1259_v36 = vpop.f32.mrf.mxu0 }
 0x8f8   :  { %v4279_v37 = vpack.i.bf16 %v1259_v36, %v1233_v34  ;;  %v4061_v34 = vld [vmem:[%s5603_s17 + $0x3c] sm:$0xf0]  ;;  %v4053_v36 = vld [vmem:[%s5603_s17 + $0x4] sm:$0xf] }
 0x8fa   :  { %4280 = vrot.lane.b32.xlu0 %v4279_v37, %s4415_s26  ;;  %v3391_v37 = vld [vmem:[%s5603_s17 + $0x40] sm:$0xf0] }
 0x8ff   :  { %v1285_v11 = vpop.f32.mrf.mxu1  ;;  %v1363_v14 = vpop.f32.mrf.mxu0 }
 0x900   :  { %v4284_v42 = vpack.i.bf16 %v1311_v38, %v1285_v11  ;;  %v4289_v43 = vpack.i.bf16 %v1363_v14, %v1337_v39  ;;  %v3397_v38 = vld [vmem:[%s5603_s17 + $0x8] sm:$0xf]  ;;  %v3394_v39 = vor.u32 %v4053_v36, %v3391_v37  ;;  %v4054_v14 = vld [vmem:[%s5603_s17 + $0xc] sm:$0xf] }
 0x901   :  { %v4062_v11 = vld [vmem:[%s5603_s17 + $0x44] sm:$0xf0]  ;;  %v4074_v37 = vld [vmem:[%s5603_s17 + $0xac] sm:$0xf] }
 0x902   :  { %4290 = vrot.lane.b32.xlu1 %v4289_v43, %s4416_s2  ;;  %4285 = vrot.lane.b32.xlu2 %v4284_v42, %s5631_s8  ;;  %v3399_v42 = vld [vmem:[%s5603_s17 + $0x48] sm:$0xf0]  ;;  %v3398_v43 = vor.u32 %v4062_v11, %v3397_v38  ;;  %v4082_v36 = vld [vmem:[%s5603_s17 + $0xe4] sm:$0xf0] }
 0x903   :  { %v3402_v44 = vor.u32 %v4054_v14, %v3399_v42  ;;  %1745 = vmatpush.bf16.msrb.mxu3 %v3394_v39  ;;  %v3495_v38 = vld [vmem:[%s5603_s17 + $0xe8] sm:$0xf0]  ;;  %v3421_v42 = vld [vmem:[%s5603_s17 + $0x20] sm:$0xf] }
 0x904   :  { %1759 = vmatpush.bf16.msra.mxu0 %v3398_v43  ;;  %v4065_v43 = vld [vmem:[%s5603_s17 + $0x5c] sm:$0xf0] }
 0x905   :  { %1773 = vmatpush.bf16.msrb.mxu1 %v3402_v44 }
 0x95c   :  { %v4286_v47 = vpop.permute.xlu2 %4285 }
 0x95d   :  { %v4288_v50 = vunpack.i.h.bf16 %v4286_v47  ;;  %v4287_v51 = vunpack.i.l.bf16 %v4286_v47 }
 0x96c   :  { %v4281_v15 = vpop.permute.xlu0 %4280 }
 0x96d   :  { %v4283_v46 = vunpack.i.h.bf16 %v4281_v15  ;;  %v4282_v13 = vunpack.i.l.bf16 %v4281_v15  ;;  %v3469_v15 = vld [vmem:[%s5603_s17 + $0x90] sm:$0xf] }
 0x96f   :  { %v1390_v3 = vsel %vm136_vm1, %v1181_v35, %v4282_v13  ;;  %v1391_v49 = vsel %vm136_vm1, %v1207_v17, %v4283_v46  ;;  %v3389_v17 = vld [vmem:[%s5603_s17] sm:$0xf]  ;;  %v4079_v46 = vld [vmem:[%s5603_s17 + $0xcc] sm:$0xf0]  ;;  %v4071_v13 = vld [vmem:[%s5603_s17 + $0x94] sm:$0xf] }
 0x970   :  { %v1392_v58 = vsel %vm665_vm2, %v1390_v3, %v4287_v51  ;;  %v1393_v59 = vsel %vm665_vm2, %v1391_v49, %v4288_v50  ;;  %v3390_v35 = vor.u32 %v4061_v34, %v3389_v17  ;;  %v3470_v3 = vor.u32 %v4079_v46, %v3469_v15  ;;  %v3471_v49 = vld [vmem:[%s5603_s17 + $0xd0] sm:$0xf0]  ;;  %v3477_v50 = vld [vmem:[%s5603_s17 + $0x98] sm:$0xf]  ;;  %v3487_v17 = vld [vmem:[%s5603_s17 + $0xe0] sm:$0xf0] }
 0x971   :  { %v4080_v51 = vld [vmem:[%s5603_s17 + $0xd4] sm:$0xf0]  ;;  %v4057_v15 = vld [vmem:[%s5603_s17 + $0x24] sm:$0xf] }
 0x972   :  { %1731 = vmatpush.bf16.msrb.mxu2 %v3390_v35  ;;  %v3423_v46 = vld [vmem:[%s5603_s17 + $0x60] sm:$0xf0] }
 0x974   :  { %v4291_v55 = vpop.permute.xlu1 %4290 }
 0x975   :  { %v4293_v56 = vunpack.i.h.bf16 %v4291_v55  ;;  %v4292_v57 = vunpack.i.l.bf16 %v4291_v55  ;;  %v3474_v55 = vor.u32 %v4071_v13, %v3471_v49  ;;  %v3429_v13 = vld [vmem:[%s5603_s17 + $0x28] sm:$0xf]  ;;  %v3431_v49 = vld [vmem:[%s5603_s17 + $0x68] sm:$0xf0] }
 0x976   :  { %1786 = vmatpush.bf16.msra.mxu2 %v3470_v3  ;;  %v4058_v3 = vld [vmem:[%s5603_s17 + $0x2c] sm:$0xf] }
 0x977   :  { %v1394_v60 = vsel %vm668_vm3, %v1392_v58, %v4292_v57  ;;  %v1395_v61 = vsel %vm668_vm3, %v1393_v59, %v4293_v56  ;;  %v3478_v56 = vor.u32 %v4080_v51, %v3477_v50  ;;  %v4072_v57 = vld [vmem:[%s5603_s17 + $0x9c] sm:$0xf]  ;;  %v3405_v59 = vld [vmem:[%s5603_s17 + $0x10] sm:$0xf]  ;;  %1800 = vmatpush.bf16.msra.mxu3 %v3474_v55  ;;  %v3422_v50 = vor.u32 %v4065_v43, %v3421_v42  ;;  %v4102_v43 = vld [vmem:[%s5605_s19 + $0x88] sm:$0xff] }
 0x978   :  { %v1396_v62 = vpack.c.bf16 %v1395_v61, %v1394_v60  ;;  %v3479_v58 = vld [vmem:[%s5603_s17 + $0xd8] sm:$0xf0]  ;;  %v3426_v51 = vor.u32 %v4057_v15, %v3423_v46  ;;  %v4087_v42 = vld [vmem:[%s5605_s19 + $0x10] sm:$0xff]  ;;  %v4094_v15 = vld [vmem:[%s5605_s19 + $0x48] sm:$0xff] }
 0x979   :  { %1814 = vmatpush.bf16.msrb.mxu0 %v3478_v56  ;;  %v3434_v56 = vor.u32 %v4058_v3, %v3431_v49  ;;  %v4101_v46 = vld [vmem:[%s5605_s19 + $0x80] sm:$0xff]  ;;  %v4148_v3 = vld [vmem:[%s5605_s19 + $0x1f8] sm:$0xff] }
 0x97a   :  { %3386 = vmatmul.msk.bf16.vlgmr.msra.gmra.mxu1 %vm102_vm0, %v1396_v62  ;;  %v3482_v62 = vor.u32 %v4072_v57, %v3479_v58  ;;  %v3501_v57 = vld [vmem:[%s5603_s17 + $0xb0] sm:$0xf]  ;;  %v4085_v49 = vld [vmem:[%s5605_s19] sm:$0xff] }
 0x97b   :  { %v4083_v58 = vld [vmem:[%s5603_s17 + $0xec] sm:$0xf0] }
 0x97c   :  { %1828 = vmatpush.bf16.msra.mxu1 %v3482_v62  ;;  %v4084_v62 = vld [vmem:[%s5603_s17 + $0xf4] sm:$0xf0] }
 0x9f7   :  { %v1429_v0 = vpop.f32.mrf.mxu1 }
 0x9f8   :  { %v1430_v1 = vadd.f32 %v4300_v63, %v1429_v0  ;;  %v4055_v0 = vld [vmem:[%s5603_s17 + $0x14] sm:$0xf] }
 0x9fa   :  { %v1434_v45 = vadd.f32 %v1430_v1, %v4757_v40 }
 0x9fc   :  { %v1438_v2 = vsel %vm102_vm0, %v1434_v45, 0.0 }
 0x9fd   :  { %1439 = vadd.xlane.f32.xlu0 %v1438_v2  ;;  %v3407_v2 = vld [vmem:[%s5603_s17 + $0x50] sm:$0xf0] }
 0x9ff   :  { %v1431_v4 = vpop.f32.mrf.mxu1 }
 0xa00   :  { %v1432_v5 = vadd.f32 %v4300_v63, %v1431_v4  ;;  %v4063_v63 = vld [vmem:[%s5603_s17 + $0x4c] sm:$0xf0]  ;;  %v3413_v4 = vld [vmem:[%s5603_s17 + $0x18] sm:$0xf] }
 0xa02   :  { %v1435_v9 = vadd.f32 %v1432_v5, %v4759_v41  ;;  %v4064_v5 = vld [vmem:[%s5603_s17 + $0x54] sm:$0xf0] }
 0xa04   :  { %v1441_v54 = vsel %vm102_vm0, %v1435_v9, 0.0 }
 0xa05   :  { %1442 = vadd.xlane.f32.xlu2 %v1441_v54  ;;  %v3414_v54 = vor.u32 %v4064_v5, %v3413_v4  ;;  %v4067_v4 = vld [vmem:[%s5603_s17 + $0x6c] sm:$0xf0] }
 0xa07   :  { %1815 = vmatpush.bf16.msrb.mxu0 %v3414_v54  ;;  %v4059_v54 = vld [vmem:[%s5603_s17 + $0x34] sm:$0xf] }
 0xa70   :  { %v1440_v16 = vpop.xlane.xlu0 %1439 }
 0xa71   :  { %v1444_v48 = vmul.f32 %v1440_v16, %v4722_v52  ;;  %v4056_v16 = vld [vmem:[%s5603_s17 + $0x1c] sm:$0xf] }
 0xa73   :  { %v4893_v53 = vsub.f32 %v1434_v45, %v1444_v48  ;;  %v3406_v45 = vor.u32 %v4063_v63, %v3405_v59  ;;  %v3415_v48 = vld [vmem:[%s5603_s17 + $0x58] sm:$0xf0]  ;;  %v4075_v59 = vld [vmem:[%s5603_s17 + $0xb4] sm:$0xf] }
 0xa74   :  { %v4076_v63 = vld [vmem:[%s5603_s17 + $0xbc] sm:$0xf] }
 0xa75   :  { %v1448_v6 = vmul.f32 %v4893_v53, %v4893_v53  ;;  %1787 = vmatpush.bf16.msra.mxu2 %v3406_v45 }
 0xa77   :  { %v1450_v40 = vsel %vm102_vm0, %v1448_v6, 0.0 }
 0xa78   :  { %v1443_v7 = vpop.xlane.xlu2 %1442  ;;  %1451 = vadd.xlane.f32.xlu1 %v1450_v40  ;;  %v3418_v40 = vor.u32 %v4056_v16, %v3415_v48  ;;  %v3439_v16 = vld [vmem:[%s5603_s17 + $0x70] sm:$0xf0]  ;;  %v3445_v48 = vld [vmem:[%s5603_s17 + $0x38] sm:$0xf] }
 0xa79   :  { %v1445_v8 = vmul.f32 %v1443_v7, %v4722_v52 }
 0xa7a   :  { %1829 = vmatpush.bf16.msra.mxu1 %v3418_v40  ;;  %v4060_v40 = vld [vmem:[%s5603_s17 + $0x3c] sm:$0xf] }
 0xa7b   :  { %v4899_v12 = vsub.f32 %v1435_v9, %v1445_v8  ;;  %v3410_v9 = vor.u32 %v4055_v0, %v3407_v2  ;;  %v3511_v0 = vld [vmem:[%s5603_s17 + $0xf8] sm:$0xf0]  ;;  %v3437_v2 = vld [vmem:[%s5603_s17 + $0x30] sm:$0xf] }
 0xa7d   :  { %v1449_v41 = vmul.f32 %v4899_v12, %v4899_v12  ;;  %1801 = vmatpush.bf16.msra.mxu3 %v3410_v9  ;;  %v3514_v9 = vor.u32 %v4076_v63, %v3511_v0  ;;  %v4130_v63 = vld [vmem:[%s5605_s19 + $0x168] sm:$0xff]  ;;  %v4137_v0 = vld [vmem:[%s5605_s19 + $0x1a0] sm:$0xff] }
 0xa7f   :  { %v1453_v18 = vsel %vm102_vm0, %v1449_v41, 0.0 }
 0xa80   :  { %1454 = vadd.xlane.f32.xlu0 %v1453_v18 }
 0xaeb   :  { %v1452_v22 = vpop.xlane.xlu1 %1451 }
 0xaec   :  { %v1456_v28 = vmul.f32 %v1452_v22, %v4722_v52 }
 0xaee   :  { %v4929_v23 = vadd.f32 1e-05, %v1456_v28 }
 0xaf0   :  { %4376 = vrsqrt.f32 %v4929_v23  ;;  %vm1466_vm12 = vweird.f32 %v4929_v23 }
 0xaf3   :  { %v1455_v10 = vpop.xlane.xlu0 %1454 }
 0xaf4   :  { %v1457_v47 = vmul.f32 %v1455_v10, %v4722_v52  ;;  %v3498_v10 = vor.u32 %v4074_v37, %v3495_v38  ;;  %v4088_v37 = vld [vmem:[%s5605_s19 + $0x18] sm:$0xff] }
 0xaf5   :  { %v4096_v38 = vld [vmem:[%s5605_s19 + $0x58] sm:$0xff] }
 0xaf6   :  { %v4377_v60 = vpop.eup %4376  ;;  %v1459_v61 = vadd.f32 1e-05, %v1457_v47  ;;  %v4066_v47 = vld [vmem:[%s5603_s17 + $0x64] sm:$0xf0] }
 0xaf7   :  { %v1461_v1 = vmul.f32 %v4377_v60, %v4929_v23  ;;  %vm1467_vm11 = vweird.f32 %v4377_v60  ;;  %v4073_v23 = vld [vmem:[%s5603_s17 + $0xa4] sm:$0xf]  ;;  %v3430_v55 = vor.u32 %v4066_v47, %v3429_v13  ;;  %v4140_v47 = vld [vmem:[%s5605_s19 + $0x1b8] sm:$0xff] }
 0xaf8   :  { %4378 = vrsqrt.f32 %v1459_v61  ;;  %vm1468_vm13 = vmor %vm1466_vm12, %vm1467_vm11  ;;  %vm1476_vm15 = vweird.f32 %v1459_v61  ;;  %v3490_v14 = vor.u32 %v4073_v23, %v3487_v17  ;;  %v4089_v23 = vld [vmem:[%s5605_s19 + $0x20] sm:$0xff] }
 0xaf9   :  { %v1462_v6 = vmul.f32 %v4377_v60, %v1461_v1  ;;  %v3502_v1 = vor.u32 %v4083_v58, %v3501_v57  ;;  %v4097_v17 = vld [vmem:[%s5605_s19 + $0x60] sm:$0xff]  ;;  %v4147_v57 = vld [vmem:[%s5605_s19 + $0x1f0] sm:$0xff] }
 0xafa   :  { %v4109_v13 = vld [vmem:[%s5605_s19 + $0xc0] sm:$0xff]  ;;  %v4123_v58 = vld [vmem:[%s5605_s19 + $0x130] sm:$0xff] }
 0xafb   :  { %v1463_v7 = vmul.f32 0.5, %v1462_v6  ;;  %v4068_v6 = vld [vmem:[%s5603_s17 + $0x74] sm:$0xf0] }
 0xafd   :  { %v1464_v8 = vsub.f32 1.5, %v1463_v7  ;;  %v3447_v7 = vld [vmem:[%s5603_s17 + $0x78] sm:$0xf0] }
 0xafe   :  { %v4379_v41 = vpop.eup %4378 }
 0xaff   :  { %v1465_v18 = vmul.f32 %v4377_v60, %v1464_v8  ;;  %v1471_v19 = vmul.f32 %v4379_v41, %v1459_v61  ;;  %vm1477_vm14 = vweird.f32 %v4379_v41  ;;  %v3509_v61 = vld [vmem:[%s5603_s17 + $0xb8] sm:$0xf]  ;;  %v3438_v8 = vor.u32 %v4067_v4, %v3437_v2  ;;  %v4121_v4 = vld [vmem:[%s5605_s19 + $0x120] sm:$0xff] }
 0xb00   :  { %vm1478_vm1 = vmor %vm1476_vm15, %vm1477_vm14  ;;  %v3510_v5 = vor.u32 %v4084_v62, %v3509_v61  ;;  %v4146_v61 = vld [vmem:[%s5605_s19 + $0x1e8] sm:$0xff]  ;;  %v4144_v2 = vld [vmem:[%s5605_s19 + $0x1d8] sm:$0xff] }
 0xb01   :  { %v1472_v20 = vmul.f32 %v4379_v41, %v1471_v19  ;;  %v1469_v21 = vsel %vm1468_vm13, %v4377_v60, %v1465_v18  ;;  %v3503_v60 = vld [vmem:[%s5603_s17 + $0xf0] sm:$0xf0]  ;;  %v3446_v18 = vor.u32 %v4068_v6, %v3445_v48  ;;  %v3450_v19 = vor.u32 %v4060_v40, %v3447_v7  ;;  %v4122_v62 = vld [vmem:[%s5605_s19 + $0x128] sm:$0xff]  ;;  %v4128_v48 = vld [vmem:[%s5605_s19 + $0x158] sm:$0xff] }
 0xb02   :  { %v1480_v26 = vmul.f32 %v1469_v21, %v4893_v53  ;;  %v4081_v53 = vld [vmem:[%s5603_s17 + $0xdc] sm:$0xf0]  ;;  %v3506_v45 = vor.u32 %v4075_v59, %v3503_v60  ;;  %v4116_v21 = vld [vmem:[%s5605_s19 + $0xf8] sm:$0xff]  ;;  %v4131_v59 = vld [vmem:[%s5605_s19 + $0x170] sm:$0xff] }
 0xb03   :  { %v1473_v22 = vmul.f32 0.5, %v1472_v20  ;;  %v3486_v11 = vor.u32 %v4081_v53, %v3485_v33  ;;  %v4108_v20 = vld [vmem:[%s5605_s19 + $0xb8] sm:$0xff]  ;;  %v4105_v33 = vld [vmem:[%s5605_s19 + $0xa0] sm:$0xff]  ;;  %v4138_v60 = vld [vmem:[%s5605_s19 + $0x1a8] sm:$0xff] }
 0xb04   :  { %v1485_v30 = vmul.f32 %v4301_v25, %v1480_v26  ;;  %v4115_v26 = vld [vmem:[%s5605_s19 + $0xf0] sm:$0xff]  ;;  %v4113_v53 = vld [vmem:[%s5605_s19 + $0xe0] sm:$0xff]  ;;  %v4134_v6 = vld [vmem:[%s5605_s19 + $0x188] sm:$0xff] }
 0xb05   :  { %v1474_v24 = vsub.f32 1.5, %v1473_v22  ;;  %v4092_v22 = vld [vmem:[%s5605_s19 + $0x38] sm:$0xff]  ;;  %v4142_v40 = vld [vmem:[%s5605_s19 + $0x1c8] sm:$0xff]  ;;  %v4119_v7 = vld [vmem:[%s5605_s19 + $0x110] sm:$0xff] }
 0xb06   :  { %v5030_v34 = vadd.f32 %v4302_v29, %v1485_v30  ;;  %v4114_v30 = vld [vmem:[%s5605_s19 + $0xe8] sm:$0xff] }
 0xb07   :  { %v1475_v27 = vmul.f32 %v4379_v41, %v1474_v24  ;;  %v4100_v24 = vld [vmem:[%s5605_s19 + $0x78] sm:$0xff] }
 0xb09   :  { %v1479_v28 = vsel %vm1478_vm1, %v4379_v41, %v1475_v27  ;;  %v3442_v41 = vor.u32 %v4059_v54, %v3439_v16  ;;  %v4091_v27 = vld [vmem:[%s5605_s19 + $0x30] sm:$0xff]  ;;  %v4120_v16 = vld [vmem:[%s5605_s19 + $0x118] sm:$0xff] }
 0xb0a   :  { %v1481_v31 = vmul.f32 %v1479_v28, %v4899_v12  ;;  %v3493_v12 = vld [vmem:[%s5603_s17 + $0xa8] sm:$0xf]  ;;  %v4099_v28 = vld [vmem:[%s5605_s19 + $0x70] sm:$0xff] }
 0xb0b   :  { %v3494_v44 = vor.u32 %v4082_v36, %v3493_v12  ;;  %v4104_v12 = vld [vmem:[%s5605_s19 + $0x98] sm:$0xff]  ;;  %v4143_v54 = vld [vmem:[%s5605_s19 + $0x1d0] sm:$0xff] }
 0xb0c   :  { %v1486_v32 = vmul.f32 %v4301_v25, %v1481_v31  ;;  %v4107_v25 = vld [vmem:[%s5605_s19 + $0xb0] sm:$0xff]  ;;  %v4090_v31 = vld [vmem:[%s5605_s19 + $0x28] sm:$0xff]  ;;  %v4112_v36 = vld [vmem:[%s5605_s19 + $0xd8] sm:$0xff] }
 0xb0e   :  { %v5032_v35 = vadd.f32 %v4302_v29, %v1486_v32  ;;  %v4106_v29 = vld [vmem:[%s5605_s19 + $0xa8] sm:$0xff] }
 0xb0f   :  { %v4098_v32 = vld [vmem:[%s5605_s19 + $0x68] sm:$0xff] }
 0xb10   :  { %v5045_v39 = vpack.c.bf16 %v5032_v35, %v5030_v34 }
 0xb12   :  { %3515 = vmatmul.msk.bf16.vlgmr.msrb.gmra.mxu2 %vm102_vm0, %v5045_v39  ;;  %3516 = vmatmul.msk.bf16.vlgmr.msrb.gmra.mxu3 %vm102_vm0, %v5045_v39 }
 0xb13   :  { %3517 = vmatmul.msk.bf16.vlgmr.msra.gmra.mxu0 %vm102_vm0, %v5045_v39  ;;  %3518 = vmatmul.msk.bf16.vlgmr.msrb.gmra.mxu1 %vm102_vm0, %v5045_v39 }
 0xb14   :  { %1842 = vmatpush.bf16.msrb.mxu2 %v3486_v11  ;;  %1856 = vmatpush.bf16.msrb.mxu3 %v3490_v14  ;;  %v4103_v11 = vld [vmem:[%s5605_s19 + $0x90] sm:$0xff] }
 0xb15   :  { %1870 = vmatpush.bf16.msra.mxu0 %v3494_v44  ;;  %1884 = vmatpush.bf16.msrb.mxu1 %v3498_v10  ;;  %v4111_v14 = vld [vmem:[%s5605_s19 + $0xd0] sm:$0xff]  ;;  %v4110_v44 = vld [vmem:[%s5605_s19 + $0xc8] sm:$0xff] }
 0xb16   :  { %v4086_v10 = vld [vmem:[%s5605_s19 + $0x8] sm:$0xff] }
 0xb18   :  { %1843 = vmatpush.bf16.msrb.mxu2 %v3422_v50  ;;  %1857 = vmatpush.bf16.msrb.mxu3 %v3426_v51  ;;  %v4093_v50 = vld [vmem:[%s5605_s19 + $0x40] sm:$0xff]  ;;  %v4124_v51 = vld [vmem:[%s5605_s19 + $0x138] sm:$0xff] }
 0xb19   :  { %1871 = vmatpush.bf16.msra.mxu0 %v3430_v55  ;;  %1885 = vmatpush.bf16.msrb.mxu1 %v3434_v56  ;;  %v4132_v55 = vld [vmem:[%s5605_s19 + $0x178] sm:$0xff]  ;;  %v4139_v56 = vld [vmem:[%s5605_s19 + $0x1b0] sm:$0xff] }
 0xb22   :  { %3519 = vmatmul.msk.bf16.vlgmr.msra.gmra.mxu2 %vm102_vm0, %v5045_v39  ;;  %3520 = vmatmul.msk.bf16.vlgmr.msra.gmra.mxu3 %vm102_vm0, %v5045_v39 }
 0xb23   :  { %3521 = vmatmul.msk.bf16.vlgmr.msrb.gmra.mxu0 %vm102_vm0, %v5045_v39  ;;  %3522 = vmatmul.msk.bf16.vlgmr.msra.gmra.mxu1 %vm102_vm0, %v5045_v39 }
 0xb24   :  { %1898 = vmatpush.bf16.msra.mxu2 %v3502_v1  ;;  %1912 = vmatpush.bf16.msra.mxu3 %v3506_v45  ;;  %v4145_v1 = vld [vmem:[%s5605_s19 + $0x1e0] sm:$0xff]  ;;  %v4136_v45 = vld [vmem:[%s5605_s19 + $0x198] sm:$0xff] }
 0xb25   :  { %1926 = vmatpush.bf16.msrb.mxu0 %v3510_v5  ;;  %1940 = vmatpush.bf16.msra.mxu1 %v3514_v9  ;;  %v4129_v5 = vld [vmem:[%s5605_s19 + $0x160] sm:$0xff]  ;;  %v4135_v9 = vld [vmem:[%s5605_s19 + $0x190] sm:$0xff] }
 0xb28   :  { %1899 = vmatpush.bf16.msra.mxu2 %v3438_v8  ;;  %1913 = vmatpush.bf16.msra.mxu3 %v3442_v41  ;;  %v4127_v8 = vld [vmem:[%s5605_s19 + $0x150] sm:$0xff]  ;;  %v4133_v41 = vld [vmem:[%s5605_s19 + $0x180] sm:$0xff] }
 0xb29   :  { %1927 = vmatpush.bf16.msrb.mxu0 %v3446_v18  ;;  %1941 = vmatpush.bf16.msra.mxu1 %v3450_v19  ;;  %v4141_v18 = vld [vmem:[%s5605_s19 + $0x1c0] sm:$0xff]  ;;  %v4118_v19 = vld [vmem:[%s5605_s19 + $0x108] sm:$0xff] }
 0xb32   :  { %3523 = vmatmul.msk.bf16.vlgmr.msrb.gmra.mxu2 %vm102_vm0, %v5045_v39  ;;  %3524 = vmatmul.msk.bf16.vlgmr.msrb.gmra.mxu3 %vm102_vm0, %v5045_v39 }
 0xb33   :  { %3525 = vmatmul.msk.bf16.vlgmr.msra.gmra.mxu0 %vm102_vm0, %v5045_v39  ;;  %3526 = vmatmul.msk.bf16.vlgmr.msrb.gmra.mxu1 %vm102_vm0, %v5045_v39 }
 0xb34   :  { %3020 = vmatpush.bf16.msra.mxu0 %v4108_v20  ;;  %3034 = vmatpush.bf16.msrb.mxu1 %v4116_v21  ;;  %v4126_v20 = vld [vmem:[%s5605_s19 + $0x148] sm:$0xff]  ;;  %v4117_v21 = vld [vmem:[%s5605_s19 + $0x100] sm:$0xff] }
 0xb35   :  { %2992 = vmatpush.bf16.msrb.mxu2 %v4092_v22  ;;  %3006 = vmatpush.bf16.msrb.mxu3 %v4100_v24  ;;  %v4125_v22 = vld [vmem:[%s5605_s19 + $0x140] sm:$0xff] }
 0xb38   :  { %3021 = vmatpush.bf16.msra.mxu0 %v4107_v25  ;;  %3035 = vmatpush.bf16.msrb.mxu1 %v4115_v26  ;;  %v5346_v26 = vld [vmem:[%s5604_s18] sm:$0xff] }
 0xb39   :  { %2993 = vmatpush.bf16.msrb.mxu2 %v4091_v27  ;;  %3007 = vmatpush.bf16.msrb.mxu3 %v4099_v28  ;;  %v1531_v27 = vperm.slane %v5346_v26, 2  ;;  %v1532_v28 = vperm.slane %v5346_v26, 3 }
 0xb3c   :  { %3022 = vmatpush.bf16.msra.mxu0 %v4106_v29  ;;  %3036 = vmatpush.bf16.msrb.mxu1 %v4114_v30 }
 0xb3d   :  { %2994 = vmatpush.bf16.msrb.mxu2 %v4090_v31  ;;  %3008 = vmatpush.bf16.msrb.mxu3 %v4098_v32  ;;  %v1529_v31 = vperm.slane %v5346_v26, 0 }
 0xb40   :  { %3023 = vmatpush.bf16.msra.mxu0 %v4105_v33  ;;  %3037 = vmatpush.bf16.msrb.mxu1 %v4113_v53 }
 0xb41   :  { %2995 = vmatpush.bf16.msrb.mxu2 %v4089_v23  ;;  %3009 = vmatpush.bf16.msrb.mxu3 %v4097_v17 }
 0xb42   :  { %3527 = vmatmul.msk.bf16.vlgmr.msra.gmra.mxu2 %vm102_vm0, %v5045_v39  ;;  %3528 = vmatmul.msk.bf16.vlgmr.msra.gmra.mxu3 %vm102_vm0, %v5045_v39 }
 0xb43   :  { %3529 = vmatmul.msk.bf16.vlgmr.msrb.gmra.mxu0 %vm102_vm0, %v5045_v39  ;;  %3530 = vmatmul.msk.bf16.vlgmr.msra.gmra.mxu1 %vm102_vm0, %v5045_v39  ;;  %v4095_v39 = vld [vmem:[%s5605_s19 + $0x50] sm:$0xff] }
 0xb44   :  { %3024 = vmatpush.bf16.msra.mxu0 %v4104_v12  ;;  %3038 = vmatpush.bf16.msrb.mxu1 %v4112_v36  ;;  %v1530_v36 = vperm.slane %v5346_v26, 1 }
 0xb45   :  { %2996 = vmatpush.bf16.msrb.mxu2 %v4088_v37  ;;  %3010 = vmatpush.bf16.msrb.mxu3 %v4096_v38  ;;  %v4172_v37 = vld [vmem:[%s5605_s19 + $0x2b8] sm:$0xff] }
 0xb46   :  { %v4180_v38 = vld [vmem:[%s5605_s19 + $0x2f8] sm:$0xff] }
 0xb48   :  { %3025 = vmatpush.bf16.msra.mxu0 %v4103_v11  ;;  %3039 = vmatpush.bf16.msrb.mxu1 %v4111_v14 }
 0xb49   :  { %2997 = vmatpush.bf16.msrb.mxu2 %v4087_v42  ;;  %3011 = vmatpush.bf16.msrb.mxu3 %v4095_v39 }
 0xb4c   :  { %3026 = vmatpush.bf16.msra.mxu0 %v4102_v43  ;;  %3040 = vmatpush.bf16.msrb.mxu1 %v4110_v44 }
 0xb4d   :  { %2998 = vmatpush.bf16.msrb.mxu2 %v4086_v10  ;;  %3012 = vmatpush.bf16.msrb.mxu3 %v4094_v15 }
 0xb50   :  { %3027 = vmatpush.bf16.msra.mxu0 %v4101_v46  ;;  %3041 = vmatpush.bf16.msrb.mxu1 %v4109_v13  ;;  %v4171_v46 = vld [vmem:[%s5605_s19 + $0x2b0] sm:$0xff] }
 0xb51   :  { %2999 = vmatpush.bf16.msrb.mxu2 %v4085_v49  ;;  %3013 = vmatpush.bf16.msrb.mxu3 %v4093_v50  ;;  %v4179_v13 = vld [vmem:[%s5605_s19 + $0x2f0] sm:$0xff] }
 0xb54   :  { %3076 = vmatpush.bf16.msrb.mxu0 %v4140_v47  ;;  %3090 = vmatpush.bf16.msra.mxu1 %v4148_v3 }
 0xb55   :  { %3048 = vmatpush.bf16.msra.mxu2 %v4124_v51  ;;  %3062 = vmatpush.bf16.msra.mxu3 %v4132_v55  ;;  %v4156_v51 = vld [vmem:[%s5605_s19 + $0x238] sm:$0xff] }
 0xb56   :  { %v4164_v55 = vld [vmem:[%s5605_s19 + $0x278] sm:$0xff] }
 0xb58   :  { %3077 = vmatpush.bf16.msrb.mxu0 %v4139_v56  ;;  %3091 = vmatpush.bf16.msra.mxu1 %v4147_v57  ;;  %v4170_v56 = vld [vmem:[%s5605_s19 + $0x2a8] sm:$0xff] }
 0xb59   :  { %3049 = vmatpush.bf16.msra.mxu2 %v4123_v58  ;;  %3063 = vmatpush.bf16.msra.mxu3 %v4131_v59  ;;  %v4178_v57 = vld [vmem:[%s5605_s19 + $0x2e8] sm:$0xff]  ;;  %v4155_v58 = vld [vmem:[%s5605_s19 + $0x230] sm:$0xff] }
 0xb5a   :  { %v4163_v59 = vld [vmem:[%s5605_s19 + $0x270] sm:$0xff] }
 0xb5c   :  { %3078 = vmatpush.bf16.msrb.mxu0 %v4138_v60  ;;  %3092 = vmatpush.bf16.msra.mxu1 %v4146_v61  ;;  %v1535_v60 = vperm.slane %v5346_v26, 6  ;;  %v1536_v61 = vperm.slane %v5346_v26, 7 }
 0xb5d   :  { %3050 = vmatpush.bf16.msra.mxu2 %v4122_v62  ;;  %3064 = vmatpush.bf16.msra.mxu3 %v4130_v63 }
 0xb60   :  { %3079 = vmatpush.bf16.msrb.mxu0 %v4137_v0  ;;  %3093 = vmatpush.bf16.msra.mxu1 %v4145_v1  ;;  %v4169_v0 = vld [vmem:[%s5605_s19 + $0x2a0] sm:$0xff] }
 0xb61   :  { %3051 = vmatpush.bf16.msra.mxu2 %v4121_v4  ;;  %3065 = vmatpush.bf16.msra.mxu3 %v4129_v5  ;;  %v4177_v1 = vld [vmem:[%s5605_s19 + $0x2e0] sm:$0xff]  ;;  %v4154_v5 = vld [vmem:[%s5605_s19 + $0x228] sm:$0xff] }
 0xb64   :  { %3080 = vmatpush.bf16.msrb.mxu0 %v4136_v45  ;;  %3094 = vmatpush.bf16.msra.mxu1 %v4144_v2  ;;  %v1533_v45 = vperm.slane %v5346_v26, 4 }
 0xb65   :  { %3052 = vmatpush.bf16.msra.mxu2 %v4120_v16  ;;  %3066 = vmatpush.bf16.msra.mxu3 %v4128_v48 }
 0xb68   :  { %3081 = vmatpush.bf16.msrb.mxu0 %v4135_v9  ;;  %3095 = vmatpush.bf16.msra.mxu1 %v4143_v54  ;;  %v4162_v9 = vld [vmem:[%s5605_s19 + $0x268] sm:$0xff] }
 0xb69   :  { %3053 = vmatpush.bf16.msra.mxu2 %v4119_v7  ;;  %3067 = vmatpush.bf16.msra.mxu3 %v4127_v8  ;;  %v4168_v7 = vld [vmem:[%s5605_s19 + $0x298] sm:$0xff] }
 0xb6a   :  { %v4176_v8 = vld [vmem:[%s5605_s19 + $0x2d8] sm:$0xff] }
 0xb6c   :  { %3082 = vmatpush.bf16.msrb.mxu0 %v4134_v6  ;;  %3096 = vmatpush.bf16.msra.mxu1 %v4142_v40  ;;  %v1534_v40 = vperm.slane %v5346_v26, 5 }
 0xb6d   :  { %3054 = vmatpush.bf16.msra.mxu2 %v4118_v19  ;;  %3068 = vmatpush.bf16.msra.mxu3 %v4126_v20  ;;  %v4153_v19 = vld [vmem:[%s5605_s19 + $0x220] sm:$0xff] }
 0xb6e   :  { %v4161_v20 = vld [vmem:[%s5605_s19 + $0x260] sm:$0xff] }
 0xb70   :  { %3083 = vmatpush.bf16.msrb.mxu0 %v4133_v41  ;;  %3097 = vmatpush.bf16.msra.mxu1 %v4141_v18 }
 0xb71   :  { %3055 = vmatpush.bf16.msra.mxu2 %v4117_v21  ;;  %3069 = vmatpush.bf16.msra.mxu3 %v4125_v22 }
 0xb90   :  { %v1761_v24 = vpop.f32.mrf.mxu0  ;;  %v1775_v25 = vpop.f32.mrf.mxu1 }
 0xb91   :  { %v1762_v53 = vadd.f32 %v1761_v24, %v1531_v27  ;;  %v1776_v23 = vadd.f32 %v1775_v25, %v1532_v28 }
 0xb95   :  { %v1733_v29 = vpop.f32.mrf.mxu2  ;;  %v1747_v30 = vpop.f32.mrf.mxu3 }
 0xb96   :  { %v1734_v42 = vadd.f32 %v1733_v29, %v1529_v31  ;;  %v1748_v44 = vadd.f32 %v1747_v30, %v1530_v36  ;;  %v4175_v29 = vld [vmem:[%s5605_s19 + $0x2d0] sm:$0xff] }
 0xb98   :  { %v1763_v32 = vpop.f32.mrf.mxu0  ;;  %v1777_v33 = vpop.f32.mrf.mxu1 }
 0xb99   :  { %v1764_v17 = vadd.f32 %v1763_v32, %v1531_v27  ;;  %v1778_v12 = vadd.f32 %v1777_v33, %v1532_v28  ;;  %v4167_v28 = vld [vmem:[%s5605_s19 + $0x290] sm:$0xff] }
 0xb9b   :  { %v1950_v11 = vpack.c.bf16 %v1764_v17, %v1762_v53  ;;  %v1951_v14 = vpack.c.bf16 %v1778_v12, %v1776_v23  ;;  %v4152_v53 = vld [vmem:[%s5605_s19 + $0x218] sm:$0xff]  ;;  %v5425_v17 = vld [vmem:[%s5604_s18 + $0x8] sm:$0xff] }
 0xb9c   :  { %v4160_v23 = vld [vmem:[%s5605_s19 + $0x258] sm:$0xff]  ;;  %v4166_v12 = vld [vmem:[%s5605_s19 + $0x288] sm:$0xff] }
 0xb9d   :  { %3028 = vmatmul.bf16.vlgmr.msra.gmra.mxu0 %v1950_v11  ;;  %3042 = vmatmul.bf16.vlgmr.msrb.gmra.mxu1 %v1951_v14  ;;  %v1735_v39 = vpop.f32.mrf.mxu2  ;;  %v1749_v43 = vpop.f32.mrf.mxu3  ;;  %v1539_v11 = vperm.slane %v5425_v17, 2  ;;  %v1540_v14 = vperm.slane %v5425_v17, 3 }
 0xb9e   :  { %3132 = vmatpush.bf16.msra.mxu0 %v4172_v37  ;;  %3146 = vmatpush.bf16.msrb.mxu1 %v4180_v38  ;;  %v1736_v10 = vadd.f32 %v1735_v39, %v1529_v31  ;;  %v1750_v15 = vadd.f32 %v1749_v43, %v1530_v36  ;;  %v4174_v36 = vld [vmem:[%s5605_s19 + $0x2c8] sm:$0xff]  ;;  %v4151_v37 = vld [vmem:[%s5605_s19 + $0x210] sm:$0xff]  ;;  %v4165_v43 = vld [vmem:[%s5605_s19 + $0x280] sm:$0xff] }
 0xb9f   :  { %v4159_v38 = vld [vmem:[%s5605_s19 + $0x250] sm:$0xff] }
 0xba0   :  { %v1948_v47 = vpack.c.bf16 %v1736_v10, %v1734_v42  ;;  %v1949_v3 = vpack.c.bf16 %v1750_v15, %v1748_v44  ;;  %v1817_v49 = vpop.f32.mrf.mxu0  ;;  %v1831_v50 = vpop.f32.mrf.mxu1  ;;  %v4173_v44 = vld [vmem:[%s5605_s19 + $0x2c0] sm:$0xff]  ;;  %v4204_v10 = vld [vmem:[%s5605_s19 + $0x3b8] sm:$0xff] }
 0xba1   :  { %v1818_v54 = vadd.f32 %v1817_v49, %v1535_v60  ;;  %v1832_v16 = vadd.f32 %v1831_v50, %v1536_v61  ;;  %v4212_v15 = vld [vmem:[%s5605_s19 + $0x3f8] sm:$0xff] }
 0xba2   :  { %3133 = vmatpush.bf16.msra.mxu0 %v4171_v46  ;;  %3147 = vmatpush.bf16.msrb.mxu1 %v4179_v13 }
 0xba3   :  { %3000 = vmatmul.bf16.vlgmr.msrb.gmra.mxu2 %v1948_v47  ;;  %3014 = vmatmul.bf16.vlgmr.msrb.gmra.mxu3 %v1949_v3  ;;  %v4150_v47 = vld [vmem:[%s5605_s19 + $0x208] sm:$0xff] }
 0xba4   :  { %3104 = vmatpush.bf16.msrb.mxu2 %v4156_v51  ;;  %3118 = vmatpush.bf16.msrb.mxu3 %v4164_v55  ;;  %v4158_v3 = vld [vmem:[%s5605_s19 + $0x248] sm:$0xff] }
 0xba5   :  { %v1789_v62 = vpop.f32.mrf.mxu2  ;;  %v1803_v63 = vpop.f32.mrf.mxu3 }
 0xba6   :  { %3134 = vmatpush.bf16.msra.mxu0 %v4170_v56  ;;  %3148 = vmatpush.bf16.msrb.mxu1 %v4178_v57  ;;  %v1790_v21 = vadd.f32 %v1789_v62, %v1533_v45  ;;  %v1804_v25 = vadd.f32 %v1803_v63, %v1534_v40  ;;  %v1537_v56 = vperm.slane %v5425_v17, 0  ;;  %v1538_v57 = vperm.slane %v5425_v17, 1  ;;  %v4149_v62 = vld [vmem:[%s5605_s19 + $0x200] sm:$0xff] }
 0xba7   :  { %v4157_v63 = vld [vmem:[%s5605_s19 + $0x240] sm:$0xff] }
 0xba8   :  { %3105 = vmatpush.bf16.msrb.mxu2 %v4155_v58  ;;  %3119 = vmatpush.bf16.msrb.mxu3 %v4163_v59  ;;  %v1819_v2 = vpop.f32.mrf.mxu0  ;;  %v1833_v4 = vpop.f32.mrf.mxu1 }
 0xba9   :  { %v1820_v48 = vadd.f32 %v1819_v2, %v1535_v60  ;;  %v1834_v6 = vadd.f32 %v1833_v4, %v1536_v61  ;;  %v4203_v60 = vld [vmem:[%s5605_s19 + $0x3b0] sm:$0xff]  ;;  %v4196_v2 = vld [vmem:[%s5605_s19 + $0x378] sm:$0xff] }
 0xbaa   :  { %3135 = vmatpush.bf16.msra.mxu0 %v4169_v0  ;;  %3149 = vmatpush.bf16.msrb.mxu1 %v4177_v1  ;;  %v4211_v61 = vld [vmem:[%s5605_s19 + $0x3f0] sm:$0xff] }
 0xbab   :  { %v1954_v41 = vpack.c.bf16 %v1820_v48, %v1818_v54  ;;  %v1955_v18 = vpack.c.bf16 %v1834_v6, %v1832_v16  ;;  %v4202_v16 = vld [vmem:[%s5605_s19 + $0x3a8] sm:$0xff] }
 0xbac   :  { %3106 = vmatpush.bf16.msrb.mxu2 %v4154_v5  ;;  %3120 = vmatpush.bf16.msrb.mxu3 %v4162_v9  ;;  %v4210_v48 = vld [vmem:[%s5605_s19 + $0x3e8] sm:$0xff] }
 0xbad   :  { %3084 = vmatmul.bf16.vlgmr.msrb.gmra.mxu0 %v1954_v41  ;;  %3098 = vmatmul.bf16.vlgmr.msra.gmra.mxu1 %v1955_v18  ;;  %v1791_v22 = vpop.f32.mrf.mxu2  ;;  %v1805_v24 = vpop.f32.mrf.mxu3  ;;  %v4201_v41 = vld [vmem:[%s5605_s19 + $0x3a0] sm:$0xff] }
 0xbae   :  { %3136 = vmatpush.bf16.msra.mxu0 %v4168_v7  ;;  %3150 = vmatpush.bf16.msrb.mxu1 %v4176_v8  ;;  %v1792_v26 = vadd.f32 %v1791_v22, %v1533_v45  ;;  %v1806_v27 = vadd.f32 %v1805_v24, %v1534_v40  ;;  %v4188_v45 = vld [vmem:[%s5605_s19 + $0x338] sm:$0xff]  ;;  %v4187_v7 = vld [vmem:[%s5605_s19 + $0x330] sm:$0xff]  ;;  %v4209_v18 = vld [vmem:[%s5605_s19 + $0x3e0] sm:$0xff] }
 0xbaf   :  { %v4195_v8 = vld [vmem:[%s5605_s19 + $0x370] sm:$0xff]  ;;  %v4200_v24 = vld [vmem:[%s5605_s19 + $0x398] sm:$0xff] }
 0xbb0   :  { %v1952_v30 = vpack.c.bf16 %v1792_v26, %v1790_v21  ;;  %v1953_v31 = vpack.c.bf16 %v1806_v27, %v1804_v25  ;;  %3107 = vmatpush.bf16.msrb.mxu2 %v4153_v19  ;;  %3121 = vmatpush.bf16.msrb.mxu3 %v4161_v20  ;;  %v1873_v32 = vpop.f32.mrf.mxu0  ;;  %v1887_v33 = vpop.f32.mrf.mxu1  ;;  %v4186_v19 = vld [vmem:[%s5605_s19 + $0x328] sm:$0xff]  ;;  %v4208_v25 = vld [vmem:[%s5605_s19 + $0x3d8] sm:$0xff]  ;;  %v4185_v26 = vld [vmem:[%s5605_s19 + $0x320] sm:$0xff] }
 0xbb1   :  { %v1874_v49 = vadd.f32 %v1873_v32, %v1539_v11  ;;  %v1888_v50 = vadd.f32 %v1887_v33, %v1540_v14  ;;  %v4194_v20 = vld [vmem:[%s5605_s19 + $0x368] sm:$0xff]  ;;  %v4193_v27 = vld [vmem:[%s5605_s19 + $0x360] sm:$0xff]  ;;  %v4184_v32 = vld [vmem:[%s5605_s19 + $0x318] sm:$0xff] }
 0xbb2   :  { %3137 = vmatpush.bf16.msra.mxu0 %v4167_v28  ;;  %3151 = vmatpush.bf16.msrb.mxu1 %v4175_v29  ;;  %v4199_v28 = vld [vmem:[%s5605_s19 + $0x390] sm:$0xff]  ;;  %v4192_v33 = vld [vmem:[%s5605_s19 + $0x358] sm:$0xff] }
 0xbb3   :  { %3056 = vmatmul.bf16.vlgmr.msra.gmra.mxu2 %v1952_v30  ;;  %3070 = vmatmul.bf16.vlgmr.msra.gmra.mxu3 %v1953_v31  ;;  %v4207_v29 = vld [vmem:[%s5605_s19 + $0x3d0] sm:$0xff] }
 0xbb4   :  { %3108 = vmatpush.bf16.msrb.mxu2 %v4152_v53  ;;  %3122 = vmatpush.bf16.msrb.mxu3 %v4160_v23  ;;  %v4198_v53 = vld [vmem:[%s5605_s19 + $0x388] sm:$0xff] }
 0xbb5   :  { %v1845_v42 = vpop.f32.mrf.mxu2  ;;  %v1859_v39 = vpop.f32.mrf.mxu3  ;;  %v4206_v23 = vld [vmem:[%s5605_s19 + $0x3c8] sm:$0xff] }
 0xbb6   :  { %3138 = vmatpush.bf16.msra.mxu0 %v4166_v12  ;;  %3152 = vmatpush.bf16.msrb.mxu1 %v4174_v36  ;;  %v1846_v4 = vadd.f32 %v1845_v42, %v1537_v56  ;;  %v1860_v5 = vadd.f32 %v1859_v39, %v1538_v57  ;;  %v4197_v42 = vld [vmem:[%s5605_s19 + $0x380] sm:$0xff] }
 0xbb7   :  { %v4205_v39 = vld [vmem:[%s5605_s19 + $0x3c0] sm:$0xff] }
 0xbb8   :  { %3109 = vmatpush.bf16.msrb.mxu2 %v4151_v37  ;;  %3123 = vmatpush.bf16.msrb.mxu3 %v4159_v38  ;;  %v1875_v46 = vpop.f32.mrf.mxu0  ;;  %v1889_v13 = vpop.f32.mrf.mxu1  ;;  %v4183_v37 = vld [vmem:[%s5605_s19 + $0x310] sm:$0xff] }
 0xbb9   :  { %v1876_v51 = vadd.f32 %v1875_v46, %v1539_v11  ;;  %v1890_v55 = vadd.f32 %v1889_v13, %v1540_v14  ;;  %v4191_v38 = vld [vmem:[%s5605_s19 + $0x350] sm:$0xff]  ;;  %v1543_v11 = vperm.slane %v5425_v17, 6  ;;  %v1544_v14 = vperm.slane %v5425_v17, 7 }
 0xbba   :  { %3139 = vmatpush.bf16.msra.mxu0 %v4165_v43  ;;  %3153 = vmatpush.bf16.msrb.mxu1 %v4173_v44 }
 0xbbb   :  { %v1958_v58 = vpack.c.bf16 %v1876_v51, %v1874_v49  ;;  %v1959_v59 = vpack.c.bf16 %v1890_v55, %v1888_v50  ;;  %v1541_v49 = vperm.slane %v5425_v17, 4  ;;  %v1542_v50 = vperm.slane %v5425_v17, 5 }
 0xbbc   :  { %3110 = vmatpush.bf16.msrb.mxu2 %v4150_v47  ;;  %3124 = vmatpush.bf16.msrb.mxu3 %v4158_v3 }
 0xbbd   :  { %3140 = vmatmul.bf16.vlgmr.msra.gmra.mxu0 %v1958_v58  ;;  %3154 = vmatmul.bf16.vlgmr.msrb.gmra.mxu1 %v1959_v59  ;;  %v1847_v0 = vpop.f32.mrf.mxu2  ;;  %v1861_v1 = vpop.f32.mrf.mxu3 }
 0xbbe   :  { %3188 = vmatpush.bf16.msrb.mxu0 %v4204_v10  ;;  %3202 = vmatpush.bf16.msra.mxu1 %v4212_v15  ;;  %v1848_v9 = vadd.f32 %v1847_v0, %v1537_v56  ;;  %v1862_v54 = vadd.f32 %v1861_v1, %v1538_v57  ;;  %v4182_v10 = vld [vmem:[%s5605_s19 + $0x308] sm:$0xff]  ;;  %v4181_v56 = vld [vmem:[%s5605_s19 + $0x300] sm:$0xff] }
 0xbbf   :  { %v4190_v15 = vld [vmem:[%s5605_s19 + $0x348] sm:$0xff]  ;;  %v4189_v57 = vld [vmem:[%s5605_s19 + $0x340] sm:$0xff] }
 0xbc0   :  { %v1956_v6 = vpack.c.bf16 %v1848_v9, %v1846_v4  ;;  %v1957_v40 = vpack.c.bf16 %v1862_v54, %v1860_v5  ;;  %3111 = vmatpush.bf16.msrb.mxu2 %v4149_v62  ;;  %3125 = vmatpush.bf16.msrb.mxu3 %v4157_v63  ;;  %v1929_v21 = vpop.f32.mrf.mxu0  ;;  %v1943_v22 = vpop.f32.mrf.mxu1  ;;  %v4303_v9 = vld [vmem:[%s5606_s20] ss:$0 sm:$0xff] }
 0xbc1   :  { %v1930_v46 = vadd.f32 %v1929_v21, %v1543_v11  ;;  %v1944_v13 = vadd.f32 %v1943_v22, %v1544_v14 }
 0xbc2   :  { %3189 = vmatpush.bf16.msrb.mxu0 %v4203_v60  ;;  %3203 = vmatpush.bf16.msra.mxu1 %v4211_v61 }
 0xbc3   :  { %3112 = vmatmul.bf16.vlgmr.msrb.gmra.mxu2 %v1956_v6  ;;  %3126 = vmatmul.bf16.vlgmr.msrb.gmra.mxu3 %v1957_v40 }
 0xbc4   :  { %3160 = vmatpush.bf16.msra.mxu2 %v4188_v45  ;;  %3174 = vmatpush.bf16.msra.mxu3 %v4196_v2 }
 0xbc5   :  { %v1901_v30 = vpop.f32.mrf.mxu2  ;;  %v1915_v31 = vpop.f32.mrf.mxu3 }
 0xbc6   :  { %3190 = vmatpush.bf16.msrb.mxu0 %v4202_v16  ;;  %3204 = vmatpush.bf16.msra.mxu1 %v4210_v48  ;;  %v1902_v60 = vadd.f32 %v1901_v30, %v1541_v49  ;;  %v1916_v61 = vadd.f32 %v1915_v31, %v1542_v50 }
 0xbc8   :  { %3161 = vmatpush.bf16.msra.mxu2 %v4187_v7  ;;  %3175 = vmatpush.bf16.msra.mxu3 %v4195_v8  ;;  %v1931_v12 = vpop.f32.mrf.mxu0  ;;  %v1945_v36 = vpop.f32.mrf.mxu1 }
 0xbc9   :  { %v1932_v43 = vadd.f32 %v1931_v12, %v1543_v11  ;;  %v1946_v44 = vadd.f32 %v1945_v36, %v1544_v14 }
 0xbca   :  { %3191 = vmatpush.bf16.msrb.mxu0 %v4201_v41  ;;  %3205 = vmatpush.bf16.msra.mxu1 %v4209_v18 }
 0xbcb   :  { %v1962_v51 = vpack.c.bf16 %v1932_v43, %v1930_v46  ;;  %v1963_v55 = vpack.c.bf16 %v1946_v44, %v1944_v13 }
 0xbcc   :  { %3162 = vmatpush.bf16.msra.mxu2 %v4186_v19  ;;  %3176 = vmatpush.bf16.msra.mxu3 %v4194_v20 }
 0xbcd   :  { %v1903_v47 = vpop.f32.mrf.mxu2  ;;  %v1917_v3 = vpop.f32.mrf.mxu3 }
 0xbce   :  { %3192 = vmatpush.bf16.msrb.mxu0 %v4200_v24  ;;  %3206 = vmatpush.bf16.msra.mxu1 %v4208_v25  ;;  %v1904_v58 = vadd.f32 %v1903_v47, %v1541_v49  ;;  %v1918_v59 = vadd.f32 %v1917_v3, %v1542_v50 }
 0xbd0   :  { %3163 = vmatpush.bf16.msra.mxu2 %v4185_v26  ;;  %3177 = vmatpush.bf16.msra.mxu3 %v4193_v27  ;;  %v1960_v17 = vpack.c.bf16 %v1904_v58, %v1902_v60  ;;  %v1961_v62 = vpack.c.bf16 %v1918_v59, %v1916_v61 }
 0xbd2   :  { %3193 = vmatpush.bf16.msrb.mxu0 %v4199_v28  ;;  %3207 = vmatpush.bf16.msra.mxu1 %v4207_v29 }
 0xbd4   :  { %3164 = vmatpush.bf16.msra.mxu2 %v4184_v32  ;;  %3178 = vmatpush.bf16.msra.mxu3 %v4192_v33 }
 0xbd6   :  { %3194 = vmatpush.bf16.msrb.mxu0 %v4198_v53  ;;  %3208 = vmatpush.bf16.msra.mxu1 %v4206_v23 }
 0xbd8   :  { %3165 = vmatpush.bf16.msra.mxu2 %v4183_v37  ;;  %3179 = vmatpush.bf16.msra.mxu3 %v4191_v38 }
 0xbda   :  { %3195 = vmatpush.bf16.msrb.mxu0 %v4197_v42  ;;  %3209 = vmatpush.bf16.msra.mxu1 %v4205_v39 }
 0xbdc   :  { %3166 = vmatpush.bf16.msra.mxu2 %v4182_v10  ;;  %3180 = vmatpush.bf16.msra.mxu3 %v4190_v15 }
 0xbdd   :  { %3196 = vmatmul.bf16.vlgmr.msrb.gmra.mxu0 %v1962_v51  ;;  %3210 = vmatmul.bf16.vlgmr.msra.gmra.mxu1 %v1963_v55 }
 0xbe0   :  { %3167 = vmatpush.bf16.msra.mxu2 %v4181_v56  ;;  %3181 = vmatpush.bf16.msra.mxu3 %v4189_v57 }
 0xbe3   :  { %3168 = vmatmul.bf16.vlgmr.msra.gmra.mxu2 %v1960_v17  ;;  %3182 = vmatmul.bf16.vlgmr.msra.gmra.mxu3 %v1961_v62 }
 0xc1a   :  { %v3029_v1 = vpop.f32.mrf.mxu0  ;;  %v3043_v45 = vpop.f32.mrf.mxu1 }
 0xc22   :  { %v3031_v5 = vpop.f32.mrf.mxu0  ;;  %v3045_v54 = vpop.f32.mrf.mxu1 }
 0xc26   :  { %v3001_v63 = vpop.f32.mrf.mxu2  ;;  %v3015_v0 = vpop.f32.mrf.mxu3 }
 0xc27   :  { %v3002_v16 = vadd.f32 %v4303_v9, %v3001_v63 }
 0xc29   :  { %v3016_v40 = vadd.f32 %v3015_v0, %v3002_v16 }
 0xc2a   :  { %v3085_v7 = vpop.f32.mrf.mxu0  ;;  %v3099_v8 = vpop.f32.mrf.mxu1 }
 0xc2b   :  { %v3030_v41 = vadd.f32 %v3029_v1, %v3016_v40 }
 0xc2d   :  { %v3044_v20 = vadd.f32 %v3043_v45, %v3030_v41 }
 0xc2e   :  { %v3003_v2 = vpop.f32.mrf.mxu2  ;;  %v3017_v4 = vpop.f32.mrf.mxu3 }
 0xc2f   :  { %v3004_v18 = vadd.f32 %v4303_v9, %v3003_v2 }
 0xc31   :  { %v3018_v19 = vadd.f32 %v3017_v4, %v3004_v18 }
 0xc32   :  { %v3087_v25 = vpop.f32.mrf.mxu0  ;;  %v3101_v27 = vpop.f32.mrf.mxu1 }
 0xc33   :  { %v3032_v26 = vadd.f32 %v3031_v5, %v3018_v19 }
 0xc35   :  { %v3046_v29 = vadd.f32 %v3045_v54, %v3032_v26 }
 0xc36   :  { %v3057_v48 = vpop.f32.mrf.mxu2  ;;  %v3071_v6 = vpop.f32.mrf.mxu3 }
 0xc37   :  { %v3058_v24 = vadd.f32 %v3057_v48, %v3044_v20 }
 0xc39   :  { %v3072_v28 = vadd.f32 %v3071_v6, %v3058_v24 }
 0xc3a   :  { %v3141_v53 = vpop.f32.mrf.mxu0  ;;  %v3155_v36 = vpop.f32.mrf.mxu1 }
 0xc3b   :  { %v3086_v30 = vadd.f32 %v3085_v7, %v3072_v28 }
 0xc3d   :  { %v3100_v12 = vadd.f32 %v3099_v8, %v3086_v30 }
 0xc3e   :  { %v3059_v21 = vpop.f32.mrf.mxu2  ;;  %v3073_v22 = vpop.f32.mrf.mxu3 }
 0xc3f   :  { %v3060_v31 = vadd.f32 %v3059_v21, %v3046_v29 }
 0xc41   :  { %v3074_v23 = vadd.f32 %v3073_v22, %v3060_v31 }
 0xc42   :  { %v3143_v43 = vpop.f32.mrf.mxu0  ;;  %v3157_v15 = vpop.f32.mrf.mxu1 }
 0xc43   :  { %v3088_v38 = vadd.f32 %v3087_v25, %v3074_v23 }
 0xc45   :  { %v3102_v39 = vadd.f32 %v3101_v27, %v3088_v38 }
 0xc46   :  { %v3113_v32 = vpop.f32.mrf.mxu2  ;;  %v3127_v33 = vpop.f32.mrf.mxu3 }
 0xc47   :  { %v3114_v37 = vadd.f32 %v3113_v32, %v3100_v12  ;;  %v4305_v12 = vld [vmem:[%s5608_s22] ss:$0 sm:$0xff]  ;;  %s4420_s22 = smov 128  }
 0xc49   :  { %v3128_v11 = vadd.f32 %v3127_v33, %v3114_v37  ;;  %v4304_v33 = vld [vmem:[%s5607_s21] ss:$0 sm:$0xff]  ;;  %s4419_s21 = smov [#allocation2]  }
 0xc4a   :  { %s3280_s0 = sshll.u32 %s4419_s21, 4  ;;  %s3281_s0 = int_to_ptr.vmem [resolvable:$true] %s3280_s0 }
 0xc4b   :  { %v3142_v44 = vadd.f32 %v3141_v53, %v3128_v11 }
 0xc4d   :  { %v3156_v13 = vadd.f32 %v3155_v36, %v3142_v44 }
 0xc4e   :  { %v3115_v14 = vpop.f32.mrf.mxu2  ;;  %v3129_v42 = vpop.f32.mrf.mxu3 }
 0xc4f   :  { %v3116_v10 = vadd.f32 %v3115_v14, %v3102_v39 }
 0xc51   :  { %v3130_v46 = vadd.f32 %v3129_v42, %v3116_v10 }
 0xc53   :  { %v3144_v51 = vadd.f32 %v3143_v43, %v3130_v46 }
 0xc55   :  { %v3158_v58 = vadd.f32 %v3157_v15, %v3144_v51 }
 0xc5a   :  { %v3197_v50 = vpop.f32.mrf.mxu0  ;;  %v3211_v56 = vpop.f32.mrf.mxu1 }
 0xc62   :  { %v3199_v1 = vpop.f32.mrf.mxu0  ;;  %v3213_v2 = vpop.f32.mrf.mxu1 }
 0xc66   :  { %v3169_v47 = vpop.f32.mrf.mxu2  ;;  %v3183_v3 = vpop.f32.mrf.mxu3 }
 0xc67   :  { %v3170_v49 = vadd.f32 %v3169_v47, %v3156_v13 }
 0xc69   :  { %v3184_v55 = vadd.f32 %v3183_v3, %v3170_v49 }
 0xc6b   :  { %v3198_v57 = vadd.f32 %v3197_v50, %v3184_v55 }
 0xc6d   :  { %v3212_v59 = vadd.f32 %v3211_v56, %v3198_v57 }
 0xc6e   :  { %v3171_v60 = vpop.f32.mrf.mxu2  ;;  %v3185_v62 = vpop.f32.mrf.mxu3 }
 0xc6f   :  { %v3172_v61 = vadd.f32 %v3171_v60, %v3158_v58  ;;  %v3216_v17 = vadd.f32 %v3212_v59, %v5030_v34 }
 0xc71   :  { %v3186_v63 = vadd.f32 %v3185_v62, %v3172_v61  ;;  %v3220_v0 = vsel %vm102_vm0, %v3216_v17, 0.0 }
 0xc72   :  { %3221 = vadd.xlane.f32.xlu2 %v3220_v0 }
 0xc73   :  { %v3200_v45 = vadd.f32 %v3199_v1, %v3186_v63 }
 0xc75   :  { %v3214_v4 = vadd.f32 %v3213_v2, %v3200_v45 }
 0xc77   :  { %v3217_v5 = vadd.f32 %v3214_v4, %v5032_v35 }
 0xc79   :  { %v3223_v9 = vsel %vm102_vm0, %v3217_v5, 0.0 }
 0xc7a   :  { %3224 = vadd.xlane.f32.xlu1 %v3223_v9 }
 0xce5   :  { %v3222_v54 = vpop.xlane.xlu2 %3221 }
 0xce6   :  { %v3226_v16 = vmul.f32 %v3222_v54, %v4722_v52 }
 0xce8   :  { %v3228_v48 = vsub.f32 %v3216_v17, %v3226_v16 }
 0xcea   :  { %v3230_v6 = vmul.f32 %v3228_v48, %v3228_v48 }
 0xcec   :  { %v3232_v34 = vsel %vm102_vm0, %v3230_v6, 0.0 }
 0xced   :  { %v3225_v40 = vpop.xlane.xlu1 %3224  ;;  %3233 = vadd.xlane.f32.xlu0 %v3232_v34 }
 0xcee   :  { %v3227_v7 = vmul.f32 %v3225_v40, %v4722_v52 }
 0xcf0   :  { %v3229_v8 = vsub.f32 %v3217_v5, %v3227_v7 }
 0xcf2   :  { %v3231_v41 = vmul.f32 %v3229_v8, %v3229_v8 }
 0xcf4   :  { %v3235_v18 = vsel %vm102_vm0, %v3231_v41, 0.0 }
 0xcf5   :  { %3236 = vadd.xlane.f32.xlu2 %v3235_v18 }
 0xd60   :  { %v3234_v35 = vpop.xlane.xlu0 %3233 }
 0xd61   :  { %v3238_v19 = vmul.f32 %v3234_v35, %v4722_v52 }
 0xd63   :  { %v3240_v20 = vadd.f32 1e-05, %v3238_v19 }
 0xd65   :  { %4380 = vrsqrt.f32 %v3240_v20  ;;  %vm3248_vm3 = vweird.f32 %v3240_v20 }
 0xd68   :  { %v3237_v21 = vpop.xlane.xlu2 %3236 }
 0xd69   :  { %v3239_v22 = vmul.f32 %v3237_v21, %v4722_v52 }
 0xd6b   :  { %v4381_v24 = vpop.eup %4380  ;;  %v3241_v25 = vadd.f32 1e-05, %v3239_v22 }
 0xd6c   :  { %v3243_v26 = vmul.f32 %v4381_v24, %v3240_v20  ;;  %vm3249_vm2 = vweird.f32 %v4381_v24 }
 0xd6d   :  { %4382 = vrsqrt.f32 %v3241_v25  ;;  %vm3250_vm4 = vmor %vm3248_vm3, %vm3249_vm2  ;;  %vm3258_vm6 = vweird.f32 %v3241_v25 }
 0xd6e   :  { %v3244_v27 = vmul.f32 %v4381_v24, %v3243_v26 }
 0xd70   :  { %v3245_v28 = vmul.f32 0.5, %v3244_v27 }
 0xd72   :  { %v3246_v29 = vsub.f32 1.5, %v3245_v28 }
 0xd73   :  { %v4383_v30 = vpop.eup %4382 }
 0xd74   :  { %v3247_v31 = vmul.f32 %v4381_v24, %v3246_v29  ;;  %v3253_v32 = vmul.f32 %v4383_v30, %v3241_v25  ;;  %vm3259_vm5 = vweird.f32 %v4383_v30 }
 0xd75   :  { %vm3260_vm7 = vmor %vm3258_vm6, %vm3259_vm5 }
 0xd76   :  { %v3251_v53 = vsel %vm3250_vm4, %v4381_v24, %v3247_v31  ;;  %v3254_v23 = vmul.f32 %v4383_v30, %v3253_v32 }
 0xd77   :  { %v3262_v52 = vmul.f32 %v3251_v53, %v3228_v48 }
 0xd78   :  { %v3255_v36 = vmul.f32 0.5, %v3254_v23 }
 0xd79   :  { %v3267_v37 = vmul.f32 %v4304_v33, %v3262_v52 }
 0xd7a   :  { %v3256_v38 = vsub.f32 1.5, %v3255_v36 }
 0xd7b   :  { %v3272_v11 = vadd.f32 %v4305_v12, %v3267_v37 }
 0xd7c   :  { %v3257_v14 = vmul.f32 %v4383_v30, %v3256_v38 }
 0xd7d   :  { %3274 = vst.msk [vmem:[#allocation2] sm:$0xff] %vm102_vm0, %v3272_v11 }
 0xd7e   :  { %v3261_v42 = vsel %vm3260_vm7, %v4383_v30, %v3257_v14 }
 0xd7f   :  { %v3263_v39 = vmul.f32 %v3261_v42, %v3229_v8 }
 0xd81   :  { %v3268_v43 = vmul.f32 %v4304_v33, %v3263_v39 }
 0xd83   :  { %v3273_v44 = vadd.f32 %v4305_v12, %v3268_v43 }
 0xd85   :  { %3275 = vst.msk [vmem:[#allocation2 + $0x8] sm:$0xff] %vm102_vm0, %v3273_v44 }
 0xd86   :  { %3288 = dma.vmem_to_hbm [thread:$0]  %s3281_s0, 256, %s3283_s30, [#allocation3], %s4420_s22, %s4420_s22, %s4415_s26  }
 0xd87   :  { %4408 = dma.done.wait [#allocation3], 256  }
 0xd88   :  { %4409 = vsyncadd [#allocation3], 4294967040 }
 0xd89   :  { %3293 = vsyncpa [#allocation3], 1 }

</bundles_post_ra>
